<compile_context>
chip_gen: v6e
topology: v6e:2x2x1
jax: 0.10.0
libtpu: 0.0.40
codegen_flags: <defaults>
</compile_context>

<pallas_src>
import functools

import jax
import jax.numpy as jnp
from jax.experimental import pallas as pl
from jax.experimental.pallas import tpu as pltpu

LANE = 128          # output-channel lane padding (lane-dense stores / MXU width)
TM_DEFAULT = 512    # row-tile when M is large; sized for <=32 MiB scoped VMEM


def _round_up(x, m):
    return -(-x // m) * m


# ---------------------------------------------------------------------------
# Pallas kernels
# ---------------------------------------------------------------------------
def _matmul_bias_kernel(x_ref, w_ref, b_ref, o_ref, *, apply_relu):
    # bf16 x bf16 -> f32 accumulate on the MXU; bias/ReLU in f32 on the VPU.
    acc = jnp.dot(x_ref[...], w_ref[...], preferred_element_type=jnp.float32)
    acc = acc + b_ref[...]                       # (1, N) broadcasts over rows
    if apply_relu:
        acc = jnp.maximum(acc, 0.0)
    o_ref[...] = acc.astype(o_ref.dtype)


def _fc_fused_kernel(x_ref, w1_ref, b1_ref, w2_ref, b2_ref, o_ref):
    # fc1 + ReLU + fc2 fused; the (TM, 512) intermediate never leaves VMEM/vregs.
    h = jnp.dot(x_ref[...], w1_ref[...], preferred_element_type=jnp.float32)
    h = jnp.maximum(h + b1_ref[...], 0.0)
    q = jnp.dot(h.astype(w2_ref.dtype), w2_ref[...],
                preferred_element_type=jnp.float32)
    o_ref[...] = (q + b2_ref[...]).astype(o_ref.dtype)


# ---------------------------------------------------------------------------
# Pallas wrappers (M-tiled when large, single full block when small)
# ---------------------------------------------------------------------------
def pallas_matmul_bias_relu(x, w, b, *, apply_relu, out_dtype, tm=TM_DEFAULT):
    """x:(M,K) bf16, w:(K,N) bf16 with N % 128 == 0, b:(N,) f32 -> (M,N)."""
    M, K = x.shape
    K2, N = w.shape
    assert K == K2 and N % LANE == 0, (x.shape, w.shape)
    b2 = b.reshape(1, N).astype(jnp.float32)
    kernel = functools.partial(_matmul_bias_kernel, apply_relu=apply_relu)

    if M <= tm:
        bm, mp, x_p = M, M, x                      # single full-extent block
    else:
        bm = tm
        mp = _round_up(M, tm)
        x_p = jnp.pad(x, ((0, mp - M), (0, 0))) if mp != M else x

    out = pl.pallas_call(
        kernel,
        out_shape=jax.ShapeDtypeStruct((mp, N), out_dtype),
        grid=(mp // bm,),
        in_specs=[
            pl.BlockSpec((bm, K), lambda i: (i, 0)),
            pl.BlockSpec((K, N), lambda i: (0, 0)),
            pl.BlockSpec((1, N), lambda i: (0, 0)),
        ],
        out_specs=pl.BlockSpec((bm, N), lambda i: (i, 0)),
        compiler_params=pltpu.CompilerParams(
            dimension_semantics=("parallel",)),
    )(x_p, w, b2)
    return out[:M] if mp != M else out


def pallas_fc_fused(x, w1, b1, w2, b2, *, tm=TM_DEFAULT):
    """relu(x @ w1 + b1) @ w2 + b2 in one pallas_call. Returns f32 (M, N2)."""
    M, K = x.shape
    _, H = w1.shape
    _, N2 = w2.shape
    assert N2 % LANE == 0
    b1r = b1.reshape(1, H).astype(jnp.float32)
    b2r = b2.reshape(1, N2).astype(jnp.float32)

    if M <= tm:
        bm, mp, x_p = M, M, x
    else:
        bm = tm
        mp = _round_up(M, tm)
        x_p = jnp.pad(x, ((0, mp - M), (0, 0))) if mp != M else x

    out = pl.pallas_call(
        _fc_fused_kernel,
        out_shape=jax.ShapeDtypeStruct((mp, N2), jnp.float32),
        grid=(mp // bm,),
        in_specs=[
            pl.BlockSpec((bm, K), lambda i: (i, 0)),
            pl.BlockSpec((K, H), lambda i: (0, 0)),
            pl.BlockSpec((1, H), lambda i: (0, 0)),
            pl.BlockSpec((H, N2), lambda i: (0, 0)),
            pl.BlockSpec((1, N2), lambda i: (0, 0)),
        ],
        out_specs=pl.BlockSpec((bm, N2), lambda i: (i, 0)),
        compiler_params=pltpu.CompilerParams(
            dimension_semantics=("parallel",)),
    )(x_p, w1, b1r, w2, b2r)
    return out[:M] if mp != M else out


# ---------------------------------------------------------------------------
# NHWC im2col (no transposes) + conv layer wrapper
# ---------------------------------------------------------------------------
def _im2col_nhwc(x, k, s):
    """x: (B, H, W, C) -> (B*OH*OW, k*k*C), feature order (kh, kw, c)."""
    B, H, W, C = x.shape
    OH = (H - k) // s + 1
    OW = (W - k) // s + 1
    cols = []
    for i in range(k):
        for j in range(k):
            cols.append(x[:, i:i + s * (OH - 1) + 1:s,
                          j:j + s * (OW - 1) + 1:s, :])       # (B, OH, OW, C)
    p = jnp.concatenate(cols, axis=-1)                        # (B, OH, OW, k*k*C)
    # TODO(synk): fold this patch extraction into the Pallas kernel via strided
    # ref reads so the (M, k*k*C) patch matrix is never materialized in HBM.
    return p.reshape(B * OH * OW, k * k * C), (B, OH, OW)


def conv2d_relu_nhwc(x, wmat, b, *, k, stride):
    """x: (B,H,W,Cp) bf16 NHWC; wmat: (k*k*Cp, Np) bf16; b: (Np,) f32 -> NHWC."""
    patches, (B, OH, OW) = _im2col_nhwc(x, k, stride)
    out = pallas_matmul_bias_relu(patches, wmat, b, apply_relu=True,
                                  out_dtype=jnp.bfloat16)
    return out.reshape(B, OH, OW, wmat.shape[1])


# ---------------------------------------------------------------------------
# One-time weight transforms (torch layout -> kernel layout)
# ---------------------------------------------------------------------------
def conv_weight_to_matrix(w, c_in_pad, c_out_pad):
    """(outC, C, k, k) torch conv weight -> (k*k*c_in_pad, c_out_pad) bf16 matrix
    whose row order matches the NHWC im2col patch order (kh, kw, c)."""
    out_c, c, k, _ = w.shape
    wm = jnp.transpose(w, (2, 3, 1, 0))                       # (k, k, C, outC)
    wm = jnp.pad(wm, ((0, 0), (0, 0), (0, c_in_pad - c), (0, 0)))
    wm = wm.reshape(k * k * c_in_pad, out_c)
    wm = jnp.pad(wm, ((0, 0), (0, c_out_pad - out_c)))
    return wm.astype(jnp.bfloat16)


def fc1_weight_to_matrix(w, c_real, h, wd, c_pad):
    """(512, c_real*h*w) torch fc1 weight (NCHW flatten order) ->
    (h*w*c_pad, 512) bf16 matrix matching our NHWC(+channel-pad) flatten."""
    out_f, _ = w.shape
    wm = w.reshape(out_f, c_real, h, wd)
    wm = jnp.transpose(wm, (2, 3, 1, 0))                      # (h, w, c, 512)
    wm = jnp.pad(wm, ((0, 0), (0, 0), (0, c_pad - c_real), (0, 0)))
    return wm.reshape(h * wd * c_pad, out_f).astype(jnp.bfloat16)


def conv_out_hw(h, k, s):
    return (h - k) // s + 1


def init_torch_params(key, input_shape, n_actions):
    """Deterministic synthetic parameters in the torch module's native layout."""
    C, H, W = input_shape
    h1, w1 = conv_out_hw(H, 8, 4), conv_out_hw(W, 8, 4)
    h2, w2 = conv_out_hw(h1, 4, 2), conv_out_hw(w1, 4, 2)
    h3, w3 = conv_out_hw(h2, 3, 1), conv_out_hw(w2, 3, 1)
    conv_output_size = 64 * h3 * w3

    ks = jax.random.split(key, 10)
    nrm = lambda k_, s_, sc: sc * jax.random.normal(k_, s_, dtype=jnp.float32)
    params = {
        "w1": nrm(ks[0], (32, C, 8, 8), 0.05),   "b1": nrm(ks[1], (32,), 0.05),
        "w2": nrm(ks[2], (64, 32, 4, 4), 0.05),  "b2": nrm(ks[3], (64,), 0.05),
        "w3": nrm(ks[4], (64, 64, 3, 3), 0.05),  "b3": nrm(ks[5], (64,), 0.05),
        "wfc1": nrm(ks[6], (512, conv_output_size), 0.05),
        "bfc1": nrm(ks[7], (512,), 0.05),
        "wfc2": nrm(ks[8], (n_actions, 512), 0.05),
        "bfc2": nrm(ks[9], (n_actions,), 0.05),
    }
    return params, (h3, w3)


def prepare_kernel_params(p, input_shape, n_actions, h3w3):
    """Pre-transform all weights ONCE (done at init, never per forward)."""
    C = input_shape[0]
    h3, w3 = h3w3
    n_act_pad = _round_up(n_actions, LANE)
    return {
        "wm1": conv_weight_to_matrix(p["w1"], C, LANE),
        "b1": jnp.pad(p["b1"], (0, LANE - 32)),
        "wm2": conv_weight_to_matrix(p["w2"], LANE, LANE),
        "b2": jnp.pad(p["b2"], (0, LANE - 64)),
        "wm3": conv_weight_to_matrix(p["w3"], LANE, LANE),
        "b3": jnp.pad(p["b3"], (0, LANE - 64)),
        "wfc1": fc1_weight_to_matrix(p["wfc1"], 64, h3, w3, LANE),
        "bfc1": p["bfc1"],
        "wfc2": jnp.pad(p["wfc2"].T,
                        ((0, 0), (0, n_act_pad - n_actions))).astype(jnp.bfloat16),
        "bfc2": jnp.pad(p["bfc2"], (0, n_act_pad - n_actions)),
    }


# ---------------------------------------------------------------------------
# DQNNetwork forward
# ---------------------------------------------------------------------------
def dqn_forward(x_nchw, kp, n_actions):
    # One-time layout change: NCHW (torch) -> NHWC, bf16 for the MXU path.
    x = jnp.transpose(x_nchw, (0, 2, 3, 1)).astype(jnp.bfloat16)
    h = conv2d_relu_nhwc(x, kp["wm1"], kp["b1"], k=8, stride=4)
    h = conv2d_relu_nhwc(h, kp["wm2"], kp["b2"], k=4, stride=2)
    h = conv2d_relu_nhwc(h, kp["wm3"], kp["b3"], k=3, stride=1)
    B = h.shape[0]
    flat = h.reshape(B, -1)           # NHWC(+pad) flatten; wfc1 permuted to match
    q = pallas_fc_fused(flat, kp["wfc1"], kp["bfc1"], kp["wfc2"], kp["bfc2"])
    return q[:, :n_actions]           # drop the 128-lane padding on n_actions


if __name__ == "__main__":
    # Small shapes consistent with the module: (frames=4, 36, 36) keeps every
    # conv output >= 1 (36 -> 8 -> 3 -> 1); conv_output_size = 64.
    input_shape = (4, 36, 36)
    n_actions = 5
    batch = 2

    key = jax.random.PRNGKey(0)
    k_x, k_p = jax.random.split(key)
    x = jax.random.normal(k_x, (batch,) + input_shape, dtype=jnp.float32)
    torch_params, h3w3 = init_torch_params(k_p, input_shape, n_actions)
    kp = prepare_kernel_params(torch_params, input_shape, n_actions, h3w3)

    fwd = jax.jit(functools.partial(dqn_forward, n_actions=n_actions))
    q_values = fwd(x, kp)
    jax.block_until_ready(q_values)
    assert q_values.shape == (batch, n_actions), q_values.shape
    print("KERNEL_OK")
</pallas_src>

<mosaic_0001>
module attributes {stable_mosaic.version = 11 : i64} {
  func.func @_matmul_bias_kernel(%arg0: i32, %arg1: memref<128x256xbf16, #tpu.memory_space<vmem>>, %arg2: memref<256x128xbf16, #tpu.memory_space<vmem>>, %arg3: memref<1x128xf32, #tpu.memory_space<vmem>>, %arg4: memref<128x128xbf16, #tpu.memory_space<vmem>>) attributes {dimension_semantics = [#tpu.dimension_semantics<parallel>], iteration_bounds = array<i64: 1>, scalar_prefetch = 0 : i64, scratch_operands = 0 : i64, tpu.core_type = #tpu.core_type<tc>, window_params = [{transform_indices = @transform_0, window_bounds = array<i64: 128, 256>}, {pipeline_mode = #tpu.pipeline_mode<synchronous>, transform_indices = @transform_1, window_bounds = array<i64: 256, 128>}, {pipeline_mode = #tpu.pipeline_mode<synchronous>, transform_indices = @transform_2, window_bounds = array<i64: 1, 128>}, {transform_indices = @transform_3, window_bounds = array<i64: 128, 128>}]} {
    %c0 = arith.constant 0 : index
    %c0_0 = arith.constant 0 : index
    %0 = vector.load %arg1[%c0, %c0_0] : memref<128x256xbf16, #tpu.memory_space<vmem>>, vector<128x256xbf16>
    %c0_1 = arith.constant 0 : index
    %c0_2 = arith.constant 0 : index
    %1 = vector.load %arg2[%c0_1, %c0_2] : memref<256x128xbf16, #tpu.memory_space<vmem>>, vector<256x128xbf16>
    %cst = arith.constant dense<0.000000e+00> : vector<128x128xf32>
    %2 = tpu.matmul %0, %1, %cst {dimension_numbers = #tpu.dot_dimension_numbers<[1], [0], [0], [1], [0, 0, 1, 1], [], []>} : vector<128x256xbf16>, vector<256x128xbf16>, vector<128x128xf32> -> vector<128x128xf32>
    %c0_3 = arith.constant 0 : index
    %c0_4 = arith.constant 0 : index
    %3 = vector.load %arg3[%c0_3, %c0_4] : memref<1x128xf32, #tpu.memory_space<vmem>>, vector<1x128xf32>
    %4 = vector.broadcast %3 : vector<1x128xf32> to vector<128x128xf32>
    %5 = arith.addf %2, %4 : vector<128x128xf32>
    %cst_5 = arith.constant 0.000000e+00 : f32
    %6 = vector.broadcast %cst_5 : f32 to vector<128x128xf32>
    %7 = arith.maximumf %5, %6 : vector<128x128xf32>
    %8 = arith.truncf %7 : vector<128x128xf32> to vector<128x128xbf16>
    %c0_6 = arith.constant 0 : index
    %c0_7 = arith.constant 0 : index
    %9 = vector.load %arg4[%c0_6, %c0_7] : memref<128x128xbf16, #tpu.memory_space<vmem>>, vector<128x128xbf16>
    tpu.vector_store %arg4[%c0_6, %c0_7], %8 {strides = array<i32>} : memref<128x128xbf16, #tpu.memory_space<vmem>>, vector<128x128xbf16>,
    return
  }
  func.func @transform_0(%arg0: i32) -> (i32, i32) {
    %c0_i32 = arith.constant 0 : i32
    %c0_i32_0 = arith.constant 0 : i32
    return %arg0, %c0_i32 : i32, i32
  }
  func.func @transform_1(%arg0: i32) -> (i32, i32) {
    %c0_i32 = arith.constant 0 : i32
    %c0_i32_0 = arith.constant 0 : i32
    %c0_i32_1 = arith.constant 0 : i32
    return %c0_i32, %c0_i32_0 : i32, i32
  }
  func.func @transform_2(%arg0: i32) -> (i32, i32) {
    %c0_i32 = arith.constant 0 : i32
    %c0_i32_0 = arith.constant 0 : i32
    %c0_i32_1 = arith.constant 0 : i32
    return %c0_i32, %c0_i32_0 : i32, i32
  }
  func.func @transform_3(%arg0: i32) -> (i32, i32) {
    %c0_i32 = arith.constant 0 : i32
    %c0_i32_0 = arith.constant 0 : i32
    return %arg0, %c0_i32 : i32, i32
  }
}

module attributes {stable_mosaic.version = 11 : i64} {
  func.func @_matmul_bias_kernel(%arg0: i32, %arg1: memref<18x2048xbf16, #tpu.memory_space<vmem>>, %arg2: memref<2048x128xbf16, #tpu.memory_space<vmem>>, %arg3: memref<1x128xf32, #tpu.memory_space<vmem>>, %arg4: memref<18x128xbf16, #tpu.memory_space<vmem>>) attributes {dimension_semantics = [#tpu.dimension_semantics<parallel>], iteration_bounds = array<i64: 1>, scalar_prefetch = 0 : i64, scratch_operands = 0 : i64, tpu.core_type = #tpu.core_type<tc>, window_params = [{transform_indices = @transform_0, window_bounds = array<i64: 18, 2048>}, {pipeline_mode = #tpu.pipeline_mode<synchronous>, transform_indices = @transform_1, window_bounds = array<i64: 2048, 128>}, {pipeline_mode = #tpu.pipeline_mode<synchronous>, transform_indices = @transform_2, window_bounds = array<i64: 1, 128>}, {transform_indices = @transform_3, window_bounds = array<i64: 18, 128>}]} {
    %c0 = arith.constant 0 : index
    %c0_0 = arith.constant 0 : index
    %0 = vector.load %arg1[%c0, %c0_0] : memref<18x2048xbf16, #tpu.memory_space<vmem>>, vector<18x2048xbf16>
    %c0_1 = arith.constant 0 : index
    %c0_2 = arith.constant 0 : index
    %1 = vector.load %arg2[%c0_1, %c0_2] : memref<2048x128xbf16, #tpu.memory_space<vmem>>, vector<2048x128xbf16>
    %cst = arith.constant dense<0.000000e+00> : vector<18x128xf32>
    %2 = tpu.matmul %0, %1, %cst {dimension_numbers = #tpu.dot_dimension_numbers<[1], [0], [0], [1], [0, 0, 1, 1], [], []>} : vector<18x2048xbf16>, vector<2048x128xbf16>, vector<18x128xf32> -> vector<18x128xf32>
    %c0_3 = arith.constant 0 : index
    %c0_4 = arith.constant 0 : index
    %3 = vector.load %arg3[%c0_3, %c0_4] : memref<1x128xf32, #tpu.memory_space<vmem>>, vector<1x128xf32>
    %4 = vector.broadcast %3 : vector<1x128xf32> to vector<18x128xf32>
    %5 = arith.addf %2, %4 : vector<18x128xf32>
    %cst_5 = arith.constant 0.000000e+00 : f32
    %6 = vector.broadcast %cst_5 : f32 to vector<18x128xf32>
    %7 = arith.maximumf %5, %6 : vector<18x128xf32>
    %8 = arith.truncf %7 : vector<18x128xf32> to vector<18x128xbf16>
    %c0_6 = arith.constant 0 : index
    %c0_7 = arith.constant 0 : index
    %9 = vector.load %arg4[%c0_6, %c0_7] : memref<18x128xbf16, #tpu.memory_space<vmem>>, vector<18x128xbf16>
    tpu.vector_store %arg4[%c0_6, %c0_7], %8 {strides = array<i32>} : memref<18x128xbf16, #tpu.memory_space<vmem>>, vector<18x128xbf16>,
    return
  }
  func.func @transform_0(%arg0: i32) -> (i32, i32) {
    %c0_i32 = arith.constant 0 : i32
    %c0_i32_0 = arith.constant 0 : i32
    return %arg0, %c0_i32 : i32, i32
  }
  func.func @transform_1(%arg0: i32) -> (i32, i32) {
    %c0_i32 = arith.constant 0 : i32
    %c0_i32_0 = arith.constant 0 : i32
    %c0_i32_1 = arith.constant 0 : i32
    return %c0_i32, %c0_i32_0 : i32, i32
  }
  func.func @transform_2(%arg0: i32) -> (i32, i32) {
    %c0_i32 = arith.constant 0 : i32
    %c0_i32_0 = arith.constant 0 : i32
    %c0_i32_1 = arith.constant 0 : i32
    return %c0_i32, %c0_i32_0 : i32, i32
  }
  func.func @transform_3(%arg0: i32) -> (i32, i32) {
    %c0_i32 = arith.constant 0 : i32
    %c0_i32_0 = arith.constant 0 : i32
    return %arg0, %c0_i32 : i32, i32
  }
}

module attributes {stable_mosaic.version = 11 : i64} {
  func.func @_matmul_bias_kernel(%arg0: i32, %arg1: memref<2x1152xbf16, #tpu.memory_space<vmem>>, %arg2: memref<1152x128xbf16, #tpu.memory_space<vmem>>, %arg3: memref<1x128xf32, #tpu.memory_space<vmem>>, %arg4: memref<2x128xbf16, #tpu.memory_space<vmem>>) attributes {dimension_semantics = [#tpu.dimension_semantics<parallel>], iteration_bounds = array<i64: 1>, scalar_prefetch = 0 : i64, scratch_operands = 0 : i64, tpu.core_type = #tpu.core_type<tc>, window_params = [{transform_indices = @transform_0, window_bounds = array<i64: 2, 1152>}, {pipeline_mode = #tpu.pipeline_mode<synchronous>, transform_indices = @transform_1, window_bounds = array<i64: 1152, 128>}, {pipeline_mode = #tpu.pipeline_mode<synchronous>, transform_indices = @transform_2, window_bounds = array<i64: 1, 128>}, {transform_indices = @transform_3, window_bounds = array<i64: 2, 128>}]} {
    %c0 = arith.constant 0 : index
    %c0_0 = arith.constant 0 : index
    %0 = vector.load %arg1[%c0, %c0_0] : memref<2x1152xbf16, #tpu.memory_space<vmem>>, vector<2x1152xbf16>
    %c0_1 = arith.constant 0 : index
    %c0_2 = arith.constant 0 : index
    %1 = vector.load %arg2[%c0_1, %c0_2] : memref<1152x128xbf16, #tpu.memory_space<vmem>>, vector<1152x128xbf16>
    %cst = arith.constant dense<0.000000e+00> : vector<2x128xf32>
    %2 = tpu.matmul %0, %1, %cst {dimension_numbers = #tpu.dot_dimension_numbers<[1], [0], [0], [1], [0, 0, 1, 1], [], []>} : vector<2x1152xbf16>, vector<1152x128xbf16>, vector<2x128xf32> -> vector<2x128xf32>
    %c0_3 = arith.constant 0 : index
    %c0_4 = arith.constant 0 : index
    %3 = vector.load %arg3[%c0_3, %c0_4] : memref<1x128xf32, #tpu.memory_space<vmem>>, vector<1x128xf32>
    %4 = vector.broadcast %3 : vector<1x128xf32> to vector<2x128xf32>
    %5 = arith.addf %2, %4 : vector<2x128xf32>
    %cst_5 = arith.constant 0.000000e+00 : f32
    %6 = vector.broadcast %cst_5 : f32 to vector<2x128xf32>
    %7 = arith.maximumf %5, %6 : vector<2x128xf32>
    %8 = arith.truncf %7 : vector<2x128xf32> to vector<2x128xbf16>
    %c0_6 = arith.constant 0 : index
    %c0_7 = arith.constant 0 : index
    %9 = vector.load %arg4[%c0_6, %c0_7] : memref<2x128xbf16, #tpu.memory_space<vmem>>, vector<2x128xbf16>
    tpu.vector_store %arg4[%c0_6, %c0_7], %8 {strides = array<i32>} : memref<2x128xbf16, #tpu.memory_space<vmem>>, vector<2x128xbf16>,
    return
  }
  func.func @transform_0(%arg0: i32) -> (i32, i32) {
    %c0_i32 = arith.constant 0 : i32
    %c0_i32_0 = arith.constant 0 : i32
    return %arg0, %c0_i32 : i32, i32
  }
  func.func @transform_1(%arg0: i32) -> (i32, i32) {
    %c0_i32 = arith.constant 0 : i32
    %c0_i32_0 = arith.constant 0 : i32
    %c0_i32_1 = arith.constant 0 : i32
    return %c0_i32, %c0_i32_0 : i32, i32
  }
  func.func @transform_2(%arg0: i32) -> (i32, i32) {
    %c0_i32 = arith.constant 0 : i32
    %c0_i32_0 = arith.constant 0 : i32
    %c0_i32_1 = arith.constant 0 : i32
    return %c0_i32, %c0_i32_0 : i32, i32
  }
  func.func @transform_3(%arg0: i32) -> (i32, i32) {
    %c0_i32 = arith.constant 0 : i32
    %c0_i32_0 = arith.constant 0 : i32
    return %arg0, %c0_i32 : i32, i32
  }
}

module attributes {stable_mosaic.version = 11 : i64} {
  func.func @_fc_fused_kernel(%arg0: i32, %arg1: memref<2x128xbf16, #tpu.memory_space<vmem>>, %arg2: memref<128x512xbf16, #tpu.memory_space<vmem>>, %arg3: memref<1x512xf32, #tpu.memory_space<vmem>>, %arg4: memref<512x128xbf16, #tpu.memory_space<vmem>>, %arg5: memref<1x128xf32, #tpu.memory_space<vmem>>, %arg6: memref<2x128xf32, #tpu.memory_space<vmem>>) attributes {dimension_semantics = [#tpu.dimension_semantics<parallel>], iteration_bounds = array<i64: 1>, scalar_prefetch = 0 : i64, scratch_operands = 0 : i64, tpu.core_type = #tpu.core_type<tc>, window_params = [{transform_indices = @transform_0, window_bounds = array<i64: 2, 128>}, {pipeline_mode = #tpu.pipeline_mode<synchronous>, transform_indices = @transform_1, window_bounds = array<i64: 128, 512>}, {pipeline_mode = #tpu.pipeline_mode<synchronous>, transform_indices = @transform_2, window_bounds = array<i64: 1, 512>}, {pipeline_mode = #tpu.pipeline_mode<synchronous>, transform_indices = @transform_3, window_bounds = array<i64: 512, 128>}, {pipeline_mode = #tpu.pipeline_mode<synchronous>, transform_indices = @transform_4, window_bounds = array<i64: 1, 128>}, {transform_indices = @transform_5, window_bounds = array<i64: 2, 128>}]} {
    %c0 = arith.constant 0 : index
    %c0_0 = arith.constant 0 : index
    %0 = vector.load %arg1[%c0, %c0_0] : memref<2x128xbf16, #tpu.memory_space<vmem>>, vector<2x128xbf16>
    %c0_1 = arith.constant 0 : index
    %c0_2 = arith.constant 0 : index
    %1 = vector.load %arg2[%c0_1, %c0_2] : memref<128x512xbf16, #tpu.memory_space<vmem>>, vector<128x512xbf16>
    %cst = arith.constant dense<0.000000e+00> : vector<2x512xf32>
    %2 = tpu.matmul %0, %1, %cst {dimension_numbers = #tpu.dot_dimension_numbers<[1], [0], [0], [1], [0, 0, 1, 1], [], []>} : vector<2x128xbf16>, vector<128x512xbf16>, vector<2x512xf32> -> vector<2x512xf32>
    %c0_3 = arith.constant 0 : index
    %c0_4 = arith.constant 0 : index
    %3 = vector.load %arg3[%c0_3, %c0_4] : memref<1x512xf32, #tpu.memory_space<vmem>>, vector<1x512xf32>
    %4 = vector.broadcast %3 : vector<1x512xf32> to vector<2x512xf32>
    %5 = arith.addf %2, %4 : vector<2x512xf32>
    %cst_5 = arith.constant 0.000000e+00 : f32
    %6 = vector.broadcast %cst_5 : f32 to vector<2x512xf32>
    %7 = arith.maximumf %5, %6 : vector<2x512xf32>
    %8 = arith.truncf %7 : vector<2x512xf32> to vector<2x512xbf16>
    %c0_6 = arith.constant 0 : index
    %c0_7 = arith.constant 0 : index
    %9 = vector.load %arg4[%c0_6, %c0_7] : memref<512x128xbf16, #tpu.memory_space<vmem>>, vector<512x128xbf16>
    %cst_8 = arith.constant dense<0.000000e+00> : vector<2x128xf32>
    %10 = tpu.matmul %8, %9, %cst_8 {dimension_numbers = #tpu.dot_dimension_numbers<[1], [0], [0], [1], [0, 0, 1, 1], [], []>} : vector<2x512xbf16>, vector<512x128xbf16>, vector<2x128xf32> -> vector<2x128xf32>
    %c0_9 = arith.constant 0 : index
    %c0_10 = arith.constant 0 : index
    %11 = vector.load %arg5[%c0_9, %c0_10] : memref<1x128xf32, #tpu.memory_space<vmem>>, vector<1x128xf32>
    %12 = vector.broadcast %11 : vector<1x128xf32> to vector<2x128xf32>
    %13 = arith.addf %10, %12 : vector<2x128xf32>
    %c0_11 = arith.constant 0 : index
    %c0_12 = arith.constant 0 : index
    %14 = vector.load %arg6[%c0_11, %c0_12] : memref<2x128xf32, #tpu.memory_space<vmem>>, vector<2x128xf32>
    tpu.vector_store %arg6[%c0_11, %c0_12], %13 {strides = array<i32>} : memref<2x128xf32, #tpu.memory_space<vmem>>, vector<2x128xf32>,
    return
  }
  func.func @transform_0(%arg0: i32) -> (i32, i32) {
    %c0_i32 = arith.constant 0 : i32
    %c0_i32_0 = arith.constant 0 : i32
    return %arg0, %c0_i32 : i32, i32
  }
  func.func @transform_1(%arg0: i32) -> (i32, i32) {
    %c0_i32 = arith.constant 0 : i32
    %c0_i32_0 = arith.constant 0 : i32
    %c0_i32_1 = arith.constant 0 : i32
    return %c0_i32, %c0_i32_0 : i32, i32
  }
  func.func @transform_2(%arg0: i32) -> (i32, i32) {
    %c0_i32 = arith.constant 0 : i32
    %c0_i32_0 = arith.constant 0 : i32
    %c0_i32_1 = arith.constant 0 : i32
    return %c0_i32, %c0_i32_0 : i32, i32
  }
  func.func @transform_3(%arg0: i32) -> (i32, i32) {
    %c0_i32 = arith.constant 0 : i32
    %c0_i32_0 = arith.constant 0 : i32
    %c0_i32_1 = arith.constant 0 : i32
    return %c0_i32, %c0_i32_0 : i32, i32
  }
  func.func @transform_4(%arg0: i32) -> (i32, i32) {
    %c0_i32 = arith.constant 0 : i32
    %c0_i32_0 = arith.constant 0 : i32
    %c0_i32_1 = arith.constant 0 : i32
    return %c0_i32, %c0_i32_0 : i32, i32
  }
  func.func @transform_5(%arg0: i32) -> (i32, i32) {
    %c0_i32 = arith.constant 0 : i32
    %c0_i32_0 = arith.constant 0 : i32
    return %arg0, %c0_i32 : i32, i32
  }
}

</mosaic_0001>

<bundles_post_ra>
// kernel: dqn_forward.4
= control target key start
LH: loop header
LB: loop body
LE: loop exit
PB: predicated region body
PF: predicated region fallthrough
CT: control target
= control target key end

     0   :  { %s836_s1 = inlined_call_operand.vmem [shape: bf16[256,128], index: 1, kind: input, shape index: {}]   ;;  %s837_s0 = inlined_call_operand.vmem [shape: bf16[128,256], index: 0, kind: input, shape index: {}]   ;;  %s838_s2 = inlined_call_operand.vmem [shape: f32[1,128], index: 2, kind: input, shape index: {}]   ;;  %s839_s3 = inlined_call_operand.vmem [shape: bf16[128,128], index: 3, kind: output, shape index: {}]  }
   0x1   :  { %v635_v0 = vld [vmem:[%s836_s1 + $0x78] sm:$0xff]   ;;  %v637_v2 = vld [vmem:[%s836_s1 + $0x70] sm:$0xff]   ;;  %v639_v4 = vld [vmem:[%s836_s1 + $0x68] sm:$0xff]  }
   0x2   :  { %v636_v1 = vld [vmem:[%s836_s1 + $0x38] sm:$0xff]   ;;  %555 = vmatprep.subr.bf16.mxu0 %v635_v0  ;;  %619 = vmatprep.subr.bf16.mxu1 %v635_v0  ;;  %v638_v3 = vld [vmem:[%s836_s1 + $0x30] sm:$0xff]   ;;  %v640_v5 = vld [vmem:[%s836_s1 + $0x28] sm:$0xff]  }
   0x3   :  { %556 = vmatpush3.bf16.msra.mxu0 %v636_v1  ;;  %627 = vmatpush3.bf16.msra.mxu1 %v636_v1  ;;  %v641_v6 = vld [vmem:[%s836_s1 + $0x60] sm:$0xff]   ;;  %v643_v8 = vld [vmem:[%s836_s1 + $0x58] sm:$0xff]   ;;  %v645_v10 = vld [vmem:[%s836_s1 + $0x50] sm:$0xff]  }
   0x4   :  { %557 = vmatprep.subr.bf16.mxu0 %v637_v2  ;;  %620 = vmatprep.subr.bf16.mxu1 %v637_v2  ;;  %v642_v7 = vld [vmem:[%s836_s1 + $0x20] sm:$0xff]   ;;  %v644_v9 = vld [vmem:[%s836_s1 + $0x18] sm:$0xff]   ;;  %v646_v13 = vld [vmem:[%s836_s1 + $0x10] sm:$0xff]  }
   0x5   :  { %v653_v11 = vld [vmem:[%s837_s0 + $0x4] ss:$8 sps:$4 sm:$0xff]   ;;  %v651_v18 = vld [vmem:[%s837_s0] ss:$8 sps:$4 sm:$0xff]   ;;  %v657_v20 = vld [vmem:[%s837_s0 + $0x14] ss:$8 sps:$4 sm:$0xff]  }
   0x6   :  { %v656_v12 = vld [vmem:[%s837_s0 + $0x44] ss:$8 sps:$4 sm:$0xff]   ;;  %278 = vmatprep.mubr.bf16.mxu0 %v653_v11  ;;  %v654_v19 = vld [vmem:[%s837_s0 + $0x40] ss:$8 sps:$4 sm:$0xff]   ;;  %v659_v21 = vld [vmem:[%s837_s0 + $0x54] ss:$8 sps:$4 sm:$0xff]  }
   0x7   :  { %558 = vmatpush3.bf16.msra.mxu0 %v638_v3  ;;  %628 = vmatpush3.bf16.msra.mxu1 %v638_v3  ;;  %v647_v14 = vld [vmem:[%s836_s1 + $0x48] sm:$0xff]   ;;  %v649_v16 = vld [vmem:[%s836_s1 + $0x40] sm:$0xff]   ;;  %v661_v22 = vld [vmem:[%s837_s0 + $0x10] ss:$8 sps:$4 sm:$0xff]  }
   0x8   :  { %559 = vmatprep.subr.bf16.mxu0 %v639_v4  ;;  %621 = vmatprep.subr.bf16.mxu1 %v639_v4  ;;  %v648_v15 = vld [vmem:[%s836_s1 + $0x8] sm:$0xff]   ;;  %v650_v17 = vld [vmem:[%s836_s1] sm:$0xff]   ;;  %v662_v23 = vld [vmem:[%s837_s0 + $0x50] ss:$8 sps:$4 sm:$0xff]  }
   0x9   :  { %310 = vmatprep.mubr.bf16.mxu1 %v656_v12  ;;  %v663_v24 = vld [vmem:[%s837_s0 + $0x24] ss:$8 sps:$4 sm:$0xff]   ;;  %v667_v26 = vld [vmem:[%s837_s0 + $0x20] ss:$8 sps:$4 sm:$0xff]   ;;  %v669_v28 = vld [vmem:[%s837_s0 + $0x34] ss:$8 sps:$4 sm:$0xff]  }
   0xa   :  { %v665_v25 = vld [vmem:[%s837_s0 + $0x64] ss:$8 sps:$4 sm:$0xff]   ;;  %v668_v27 = vld [vmem:[%s837_s0 + $0x60] ss:$8 sps:$4 sm:$0xff]   ;;  %v671_v29 = vld [vmem:[%s837_s0 + $0x74] ss:$8 sps:$4 sm:$0xff]  }
   0xb   :  { %560 = vmatpush3.bf16.msra.mxu0 %v640_v5  ;;  %629 = vmatpush3.bf16.msra.mxu1 %v640_v5  ;;  %v673_v30 = vld [vmem:[%s837_s0 + $0x30] ss:$8 sps:$4 sm:$0xff]   ;;  %v794_v36 = vld [vmem:[%s838_s2] ss:$0 sm:$0xff] }
   0xc   :  { %561 = vmatprep.subr.bf16.mxu0 %v641_v6  ;;  %622 = vmatprep.subr.bf16.mxu1 %v641_v6  ;;  %v674_v31 = vld [vmem:[%s837_s0 + $0x70] ss:$8 sps:$4 sm:$0xff]  }
   0xf   :  { %562 = vmatpush3.bf16.msra.mxu0 %v642_v7  ;;  %630 = vmatpush3.bf16.msra.mxu1 %v642_v7 }
  0x10   :  { %563 = vmatprep.subr.bf16.mxu0 %v643_v8  ;;  %623 = vmatprep.subr.bf16.mxu1 %v643_v8 }
  0x13   :  { %564 = vmatpush3.bf16.msra.mxu0 %v644_v9  ;;  %631 = vmatpush3.bf16.msra.mxu1 %v644_v9 }
  0x14   :  { %565 = vmatprep.subr.bf16.mxu0 %v645_v10  ;;  %624 = vmatprep.subr.bf16.mxu1 %v645_v10 }
  0x17   :  { %566 = vmatpush3.bf16.msra.mxu0 %v646_v13  ;;  %632 = vmatpush3.bf16.msra.mxu1 %v646_v13 }
  0x18   :  { %567 = vmatprep.subr.bf16.mxu0 %v647_v14  ;;  %625 = vmatprep.subr.bf16.mxu1 %v647_v14 }
  0x1b   :  { %568 = vmatpush3.bf16.msra.mxu0 %v648_v15  ;;  %633 = vmatpush3.bf16.msra.mxu1 %v648_v15 }
  0x1c   :  { %569 = vmatprep.subr.bf16.mxu0 %v649_v16  ;;  %626 = vmatprep.subr.bf16.mxu1 %v649_v16 }
  0x1f   :  { %570 = vmatpush3.bf16.msra.mxu0 %v650_v17  ;;  %634 = vmatpush3.bf16.msra.mxu1 %v650_v17 }
  0x22   :  { %279 = vmatmul.mubr.bf16.vlgmr.msra.gmra.mxu0 %v651_v18  ;;  %311 = vmatmul.mubr.bf16.vlgmr.msra.gmra.mxu1 %v654_v19 }
  0x23   :  { %286 = vmatprep.mubr.bf16.mxu0 %v657_v20  ;;  %318 = vmatprep.mubr.bf16.mxu1 %v659_v21 }
  0x2a   :  { %287 = vmatmul.mubr.bf16.gmra.mxu0 %v661_v22  ;;  %319 = vmatmul.mubr.bf16.gmra.mxu1 %v662_v23 }
  0x2b   :  { %294 = vmatprep.mubr.bf16.mxu0 %v663_v24  ;;  %326 = vmatprep.mubr.bf16.mxu1 %v665_v25 }
  0x32   :  { %295 = vmatmul.mubr.bf16.gmra.mxu0 %v667_v26  ;;  %327 = vmatmul.mubr.bf16.gmra.mxu1 %v668_v27 }
  0x33   :  { %302 = vmatprep.mubr.bf16.mxu0 %v669_v28  ;;  %334 = vmatprep.mubr.bf16.mxu1 %v671_v29 }
  0x3a   :  { %303 = vmatmul.mubr.bf16.gmra.mxu0 %v673_v30  ;;  %335 = vmatmul.mubr.bf16.gmra.mxu1 %v674_v31 }
  0xe2   :  { %v571_v32 = vpop.f32.mrf.mxu0  ;;  %v595_v33 = vpop.f32.mrf.mxu1 }
  0xe4   :  { %v572_v34 = vpop.f32.mrf.mxu0  ;;  %v596_v35 = vpop.f32.mrf.mxu1 }
  0xe5   :  { %v573_v37 = vadd.f32 %v572_v34, %v571_v32  ;;  %v597_v38 = vadd.f32 %v596_v35, %v595_v33 }
  0xe6   :  { %v574_v39 = vpop.f32.mrf.mxu0  ;;  %v598_v40 = vpop.f32.mrf.mxu1 }
  0xe7   :  { %v281_v41 = vadd.f32 %v573_v37, %v794_v36  ;;  %v313_v42 = vadd.f32 %v597_v38, %v794_v36 }
  0xe8   :  { %v575_v43 = vpop.f32.mrf.mxu0  ;;  %v599_v44 = vpop.f32.mrf.mxu1 }
  0xe9   :  { %v576_v45 = vadd.f32 %v575_v43, %v574_v39  ;;  %v600_v46 = vadd.f32 %v599_v44, %v598_v40  ;;  %v343_v51 = vmax.f32 %v281_v41, 0.0  ;;  %v351_v52 = vmax.f32 %v313_v42, 0.0 }
  0xea   :  { %v577_v47 = vpop.f32.mrf.mxu0  ;;  %v601_v48 = vpop.f32.mrf.mxu1 }
  0xeb   :  { %v284_v49 = vadd.f32 %v576_v45, %v794_v36  ;;  %v316_v50 = vadd.f32 %v600_v46, %v794_v36 }
  0xec   :  { %v578_v53 = vpop.f32.mrf.mxu0  ;;  %v602_v54 = vpop.f32.mrf.mxu1 }
  0xed   :  { %v344_v55 = vmax.f32 %v284_v49, 0.0  ;;  %v352_v56 = vmax.f32 %v316_v50, 0.0  ;;  %v579_v57 = vadd.f32 %v578_v53, %v577_v47  ;;  %v603_v58 = vadd.f32 %v602_v54, %v601_v48 }
  0xee   :  { %v580_v59 = vpop.f32.mrf.mxu0  ;;  %v604_v60 = vpop.f32.mrf.mxu1 }
  0xef   :  { %v511_v61 = vpack.c.bf16 %v344_v55, %v343_v51  ;;  %v531_v62 = vpack.c.bf16 %v352_v56, %v351_v52  ;;  %v289_v63 = vadd.f32 %v579_v57, %v794_v36  ;;  %v321_v0 = vadd.f32 %v603_v58, %v794_v36 }
  0xf0   :  { %v581_v1 = vpop.f32.mrf.mxu0  ;;  %v605_v2 = vpop.f32.mrf.mxu1 }
  0xf1   :  { %512 = vst [vmem:[%s839_s3] sm:$0xff] %v511_v61   ;;  %551 = vst [vmem:[%s839_s3 + $0x20] sm:$0xff] %v531_v62   ;;  %v582_v3 = vadd.f32 %v581_v1, %v580_v59  ;;  %v606_v4 = vadd.f32 %v605_v2, %v604_v60  ;;  %v345_v9 = vmax.f32 %v289_v63, 0.0  ;;  %v353_v10 = vmax.f32 %v321_v0, 0.0 }
  0xf2   :  { %v583_v5 = vpop.f32.mrf.mxu0  ;;  %v607_v6 = vpop.f32.mrf.mxu1 }
  0xf3   :  { %v292_v7 = vadd.f32 %v582_v3, %v794_v36  ;;  %v324_v8 = vadd.f32 %v606_v4, %v794_v36 }
  0xf4   :  { %v584_v11 = vpop.f32.mrf.mxu0  ;;  %v608_v12 = vpop.f32.mrf.mxu1 }
  0xf5   :  { %v346_v13 = vmax.f32 %v292_v7, 0.0  ;;  %v354_v14 = vmax.f32 %v324_v8, 0.0  ;;  %v585_v15 = vadd.f32 %v584_v11, %v583_v5  ;;  %v609_v16 = vadd.f32 %v608_v12, %v607_v6 }
  0xf6   :  { %v586_v17 = vpop.f32.mrf.mxu0  ;;  %v610_v18 = vpop.f32.mrf.mxu1 }
  0xf7   :  { %v516_v19 = vpack.c.bf16 %v346_v13, %v345_v9  ;;  %v536_v20 = vpack.c.bf16 %v354_v14, %v353_v10  ;;  %v297_v21 = vadd.f32 %v585_v15, %v794_v36  ;;  %v329_v22 = vadd.f32 %v609_v16, %v794_v36 }
  0xf8   :  { %v587_v23 = vpop.f32.mrf.mxu0  ;;  %v611_v24 = vpop.f32.mrf.mxu1 }
  0xf9   :  { %548 = vst [vmem:[%s839_s3 + $0x8] sm:$0xff] %v516_v19   ;;  %552 = vst [vmem:[%s839_s3 + $0x28] sm:$0xff] %v536_v20   ;;  %v588_v25 = vadd.f32 %v587_v23, %v586_v17  ;;  %v612_v26 = vadd.f32 %v611_v24, %v610_v18  ;;  %v347_v31 = vmax.f32 %v297_v21, 0.0  ;;  %v355_v32 = vmax.f32 %v329_v22, 0.0 }
  0xfa   :  { %v589_v27 = vpop.f32.mrf.mxu0  ;;  %v613_v28 = vpop.f32.mrf.mxu1 }
  0xfb   :  { %v300_v29 = vadd.f32 %v588_v25, %v794_v36  ;;  %v332_v30 = vadd.f32 %v612_v26, %v794_v36 }
  0xfc   :  { %v590_v33 = vpop.f32.mrf.mxu0  ;;  %v614_v34 = vpop.f32.mrf.mxu1 }
  0xfd   :  { %v348_v35 = vmax.f32 %v300_v29, 0.0  ;;  %v356_v37 = vmax.f32 %v332_v30, 0.0  ;;  %v591_v38 = vadd.f32 %v590_v33, %v589_v27  ;;  %v615_v39 = vadd.f32 %v614_v34, %v613_v28 }
  0xfe   :  { %v592_v40 = vpop.f32.mrf.mxu0  ;;  %v616_v41 = vpop.f32.mrf.mxu1 }
  0xff   :  { %v521_v42 = vpack.c.bf16 %v348_v35, %v347_v31  ;;  %v541_v43 = vpack.c.bf16 %v356_v37, %v355_v32  ;;  %v305_v46 = vadd.f32 %v591_v38, %v794_v36  ;;  %v337_v47 = vadd.f32 %v615_v39, %v794_v36 }
 0x100   :  { %v593_v44 = vpop.f32.mrf.mxu0  ;;  %v617_v45 = vpop.f32.mrf.mxu1 }
 0x101   :  { %549 = vst [vmem:[%s839_s3 + $0x10] sm:$0xff] %v521_v42   ;;  %553 = vst [vmem:[%s839_s3 + $0x30] sm:$0xff] %v541_v43   ;;  %v594_v48 = vadd.f32 %v593_v44, %v592_v40  ;;  %v618_v49 = vadd.f32 %v617_v45, %v616_v41  ;;  %v349_v52 = vmax.f32 %v305_v46, 0.0  ;;  %v357_v53 = vmax.f32 %v337_v47, 0.0 }
 0x103   :  { %v308_v50 = vadd.f32 %v594_v48, %v794_v36  ;;  %v340_v51 = vadd.f32 %v618_v49, %v794_v36 }
 0x105   :  { %v350_v54 = vmax.f32 %v308_v50, 0.0  ;;  %v358_v55 = vmax.f32 %v340_v51, 0.0 }
 0x107   :  { %v526_v56 = vpack.c.bf16 %v350_v54, %v349_v52  ;;  %v546_v57 = vpack.c.bf16 %v358_v55, %v357_v53 }
 0x109   :  { %550 = vst [vmem:[%s839_s3 + $0x18] sm:$0xff] %v526_v56   ;;  %554 = vst [vmem:[%s839_s3 + $0x38] sm:$0xff] %v546_v57  }

// kernel: dqn_forward.6
= control target key start
LH: loop header
LB: loop body
LE: loop exit
PB: predicated region body
PF: predicated region fallthrough
CT: control target
= control target key end

     0   :  { %v1148_v21 = vmov 1966171168   ;;  %v174_v23 = vlaneseq  ;;  %vm1150_vm0 = vmmov 0   ;;  %s1413_s1 = inlined_call_operand.vmem [shape: bf16[1152,128], index: 1, kind: input, shape index: {}]   ;;  %s1414_s0 = inlined_call_operand.vmem [shape: bf16[2,1152], index: 0, kind: input, shape index: {}]   ;;  %s1415_s2 = inlined_call_operand.vmem [shape: f32[1,128], index: 2, kind: input, shape index: {}]   ;;  %s1416_s3 = inlined_call_operand.vmem [shape: bf16[2,128], index: 3, kind: output, shape index: {}]  }
   0x1   :  { %v1075_v0 = vld [vmem:[%s1413_s1 + $0x78] sm:$0xff]   ;;  %v1079_v4 = vld [vmem:[%s1413_s1 + $0x70] sm:$0xff]   ;;  %v1083_v8 = vld [vmem:[%s1413_s1 + $0x68] sm:$0xff]   ;;  %v172_v22 = vunpack.c.l.s4 %v1148_v21 }
   0x2   :  { %v1076_v1 = vld [vmem:[%s1413_s1 + $0x38] sm:$0xff]   ;;  %955 = vmatprep.subr.bf16.mxu0 %v1075_v0  ;;  %v1080_v5 = vld [vmem:[%s1413_s1 + $0x30] sm:$0xff]   ;;  %v1084_v9 = vld [vmem:[%s1413_s1 + $0x28] sm:$0xff]   ;;  %v175_v29 = vshrl.u32 %v174_v23, 7 }
   0x3   :  { %v1077_v2 = vld [vmem:[%s1413_s1 + $0xf8] sm:$0xff]   ;;  %956 = vmatpush3.bf16.msra.mxu0 %v1076_v1  ;;  %v1081_v6 = vld [vmem:[%s1413_s1 + $0xf0] sm:$0xff]   ;;  %v1085_v10 = vld [vmem:[%s1413_s1 + $0xe8] sm:$0xff]   ;;  %v173_v28 = vunpack.c.0.s8 %v172_v22 }
   0x4   :  { %v1078_v3 = vld [vmem:[%s1413_s1 + $0xb8] sm:$0xff]   ;;  %977 = vmatprep.subr.bf16.mxu1 %v1077_v2  ;;  %957 = vmatprep.subr.bf16.mxu0 %v1079_v4  ;;  %v1082_v7 = vld [vmem:[%s1413_s1 + $0xb0] sm:$0xff]   ;;  %v1086_v11 = vld [vmem:[%s1413_s1 + $0xa8] sm:$0xff]  }
   0x5   :  { %978 = vmatpush3.bf16.msra.mxu1 %v1078_v3  ;;  %v1087_v12 = vld [vmem:[%s1413_s1 + $0x60] sm:$0xff]   ;;  %v1091_v16 = vld [vmem:[%s1413_s1 + $0x58] sm:$0xff]   ;;  %v1095_v20 = vld [vmem:[%s1413_s1 + $0x50] sm:$0xff]   ;;  %v1258_v34 = vsub.s32 %v173_v28, %v175_v29 }
   0x6   :  { %979 = vmatprep.subr.bf16.mxu1 %v1081_v6  ;;  %v1088_v13 = vld [vmem:[%s1413_s1 + $0x20] sm:$0xff]   ;;  %v1092_v17 = vld [vmem:[%s1413_s1 + $0x18] sm:$0xff]   ;;  %v1096_v24 = vld [vmem:[%s1413_s1 + $0x10] sm:$0xff]  }
   0x7   :  { %958 = vmatpush3.bf16.msra.mxu0 %v1080_v5  ;;  %v1089_v14 = vld [vmem:[%s1413_s1 + $0xe0] sm:$0xff]   ;;  %v1093_v18 = vld [vmem:[%s1413_s1 + $0xd8] sm:$0xff]   ;;  %v1097_v25 = vld [vmem:[%s1413_s1 + $0xd0] sm:$0xff]  }
   0x8   :  { %959 = vmatprep.subr.bf16.mxu0 %v1083_v8  ;;  %v1090_v15 = vld [vmem:[%s1413_s1 + $0xa0] sm:$0xff]   ;;  %v1094_v19 = vld [vmem:[%s1413_s1 + $0x98] sm:$0xff]   ;;  %v1098_v26 = vld [vmem:[%s1413_s1 + $0x90] sm:$0xff]  }
   0x9   :  { %980 = vmatpush3.bf16.msra.mxu1 %v1082_v7  ;;  %v1099_v27 = vld [vmem:[%s1413_s1 + $0x48] sm:$0xff]   ;;  %v1103_v33 = vld [vmem:[%s1413_s1 + $0x40] sm:$0xff]   ;;  %v1108_v41 = vld [vmem:[%s1413_s1 + $0x178] sm:$0xff]  }
   0xa   :  { %981 = vmatprep.subr.bf16.mxu1 %v1085_v10  ;;  %v1100_v30 = vld [vmem:[%s1413_s1 + $0x8] sm:$0xff]   ;;  %v1104_v35 = vld [vmem:[%s1413_s1] sm:$0xff]   ;;  %v1110_v45 = vld [vmem:[%s1413_s1 + $0x1f8] sm:$0xff]  }
   0xb   :  { %960 = vmatpush3.bf16.msra.mxu0 %v1084_v9  ;;  %v1101_v31 = vld [vmem:[%s1413_s1 + $0xc8] sm:$0xff]   ;;  %v1105_v36 = vld [vmem:[%s1413_s1 + $0xc0] sm:$0xff]   ;;  %v1109_v47 = vld [vmem:[%s1413_s1 + $0x138] sm:$0xff]  }
   0xc   :  { %961 = vmatprep.subr.bf16.mxu0 %v1087_v12  ;;  %v1102_v32 = vld [vmem:[%s1413_s1 + $0x88] sm:$0xff]   ;;  %v15_v37 = vld [vmem:[%s1414_s0] sm:$0xff]  ;;  %v1112_v50 = vld [vmem:[%s1413_s1 + $0x170] sm:$0xff]  }
   0xd   :  { %982 = vmatpush3.bf16.msra.mxu1 %v1086_v11  ;;  %v170_v38 = vcombine.high %v15_v37, %v15_v37  ;;  %v177_v39 = vrot.slane %v15_v37, %v1258_v34  ;;  %v1107_v40 = vld [vmem:[%s1413_s1 + $0x80] sm:$0xff]   ;;  %v1111_v52 = vld [vmem:[%s1413_s1 + $0x1b8] sm:$0xff]   ;;  %v1114_v54 = vld [vmem:[%s1413_s1 + $0x1f0] sm:$0xff]  }
   0xe   :  { %983 = vmatprep.subr.bf16.mxu1 %v1089_v14  ;;  %v1113_v55 = vld [vmem:[%s1413_s1 + $0x130] sm:$0xff]   ;;  %v1116_v57 = vld [vmem:[%s1413_s1 + $0x168] sm:$0xff]   ;;  %v1120_v61 = vld [vmem:[%s1413_s1 + $0x160] sm:$0xff]  }
   0xf   :  { %962 = vmatpush3.bf16.msra.mxu0 %v1088_v13  ;;  %v185_v42 = vcombine.high %v177_v39, %v177_v39  ;;  %v193_v43 = vrot.slane %v177_v39, %v1258_v34  ;;  %v1278_v44 = vrot.slane %v170_v38, %v1258_v34  ;;  %v1115_v58 = vld [vmem:[%s1413_s1 + $0x1b0] sm:$0xff]   ;;  %v1118_v59 = vld [vmem:[%s1413_s1 + $0x1e8] sm:$0xff]   ;;  %v1122_v63 = vld [vmem:[%s1413_s1 + $0x1e0] sm:$0xff]  }
  0x10   :  { %963 = vmatprep.subr.bf16.mxu0 %v1091_v16  ;;  %v1117_v60 = vld [vmem:[%s1413_s1 + $0x128] sm:$0xff]   ;;  %v1121_v0 = vld [vmem:[%s1413_s1 + $0x120] sm:$0xff]   ;;  %v1124_v1 = vld [vmem:[%s1413_s1 + $0x158] sm:$0xff]  }
  0x11   :  { %984 = vmatpush3.bf16.msra.mxu1 %v1090_v15  ;;  %v207_v46 = vrot.slane %v185_v42, %v1258_v34  ;;  %v186_v48 = vcombine.high %v1278_v44, %v1278_v44  ;;  %v215_v49 = vcombine.high %v193_v43, %v193_v43  ;;  %v1119_v62 = vld [vmem:[%s1413_s1 + $0x1a8] sm:$0xff]   ;;  %v1123_v2 = vld [vmem:[%s1413_s1 + $0x1a0] sm:$0xff]   ;;  %v1126_v3 = vld [vmem:[%s1413_s1 + $0x1d8] sm:$0xff]  }
  0x12   :  { %985 = vmatprep.subr.bf16.mxu1 %v1093_v18  ;;  %v1125_v4 = vld [vmem:[%s1413_s1 + $0x118] sm:$0xff]   ;;  %v1128_v5 = vld [vmem:[%s1413_s1 + $0x150] sm:$0xff]   ;;  %v1132_v9 = vld [vmem:[%s1413_s1 + $0x148] sm:$0xff]  }
  0x13   :  { %964 = vmatpush3.bf16.msra.mxu0 %v1092_v17  ;;  %706 = vmatprep.mubr.bf16.mxu0 %v207_v46  ;;  %v217_v51 = vcombine.high %v207_v46, %v207_v46  ;;  %v214_v53 = vrot.slane %v186_v48, %v1258_v34  ;;  %v1127_v6 = vld [vmem:[%s1413_s1 + $0x198] sm:$0xff]   ;;  %v1130_v7 = vld [vmem:[%s1413_s1 + $0x1d0] sm:$0xff]   ;;  %v1134_v11 = vld [vmem:[%s1413_s1 + $0x1c8] sm:$0xff]   ;;  %v200_v17 = vrot.slane %v1278_v44, %v1258_v34 }
  0x14   :  { %965 = vmatprep.subr.bf16.mxu0 %v1095_v20  ;;  %v1129_v8 = vld [vmem:[%s1413_s1 + $0x110] sm:$0xff]   ;;  %v1133_v12 = vld [vmem:[%s1413_s1 + $0x108] sm:$0xff]   ;;  %v1136_v13 = vld [vmem:[%s1413_s1 + $0x140] sm:$0xff]   ;;  %v1149_v20 = vmov 0.0  }
  0x15   :  { %986 = vmatpush3.bf16.msra.mxu1 %v1094_v19  ;;  %746 = vmatprep.mubr.bf16.mxu1 %v217_v51  ;;  %v218_v56 = vcombine.high %v214_v53, %v214_v53  ;;  %v1131_v10 = vld [vmem:[%s1413_s1 + $0x190] sm:$0xff]   ;;  %v1135_v14 = vld [vmem:[%s1413_s1 + $0x188] sm:$0xff]   ;;  %v1138_v15 = vld [vmem:[%s1413_s1 + $0x1c0] sm:$0xff]   ;;  %v216_v21 = vcombine.high %v200_v17, %v200_v17 }
  0x16   :  { %987 = vmatprep.subr.bf16.mxu1 %v1097_v25  ;;  %v1137_v16 = vld [vmem:[%s1413_s1 + $0x100] sm:$0xff]   ;;  %v1140_v19 = vld [vmem:[%s1413_s1 + $0x238] sm:$0xff]   ;;  %v1141_v22 = vld [vmem:[%s1413_s1 + $0x230] sm:$0xff]  }
  0x17   :  { %966 = vmatpush3.bf16.msra.mxu0 %v1096_v24  ;;  %v1139_v18 = vld [vmem:[%s1413_s1 + $0x180] sm:$0xff]   ;;  %v882_v23 = vld.sshfl [vmem:[%s1414_s0 + $0x8] sm:$0x1 pattern:$0x75316420]  ;;  %v1145_v28 = vld [vmem:[%s1413_s1 + $0x210] sm:$0xff]  }
  0x18   :  { %967 = vmatprep.subr.bf16.mxu0 %v1099_v27  ;;  %v232_v24 = vrot.slane %v882_v23, %v1258_v34  ;;  %v1142_v25 = vld [vmem:[%s1413_s1 + $0x228] sm:$0xff]   ;;  %v1144_v27 = vld [vmem:[%s1413_s1 + $0x218] sm:$0xff]   ;;  %v881_v48 = vld [vmem:[%s1415_s2] ss:$0 sm:$0xff] }
  0x19   :  { %988 = vmatpush3.bf16.msra.mxu1 %v1098_v26  ;;  %v1143_v26 = vld [vmem:[%s1413_s1 + $0x220] sm:$0xff]   ;;  %v1146_v29 = vld [vmem:[%s1413_s1 + $0x208] sm:$0xff]  }
  0x1a   :  { %989 = vmatprep.subr.bf16.mxu1 %v1101_v31 }
  0x1b   :  { %968 = vmatpush3.bf16.msra.mxu0 %v1100_v30  ;;  %v1147_v30 = vld [vmem:[%s1413_s1 + $0x200] sm:$0xff]  }
  0x1c   :  { %969 = vmatprep.subr.bf16.mxu0 %v1103_v33 }
  0x1d   :  { %990 = vmatpush3.bf16.msra.mxu1 %v1102_v32 }
  0x1e   :  { %991 = vmatprep.subr.bf16.mxu1 %v1105_v36 }
  0x1f   :  { %970 = vmatpush3.bf16.msra.mxu0 %v1104_v35 }
  0x20   :  { %999 = vmatprep.subr.bf16.mxu0 %v1108_v41 }
  0x21   :  { %992 = vmatpush3.bf16.msra.mxu1 %v1107_v40 }
  0x22   :  { %1021 = vmatprep.subr.bf16.mxu1 %v1110_v45  ;;  %707 = vmatmul.mubr.bf16.vlgmr.msra.gmra.mxu0 %v193_v43 }
  0x23   :  { %1000 = vmatpush3.bf16.msra.mxu0 %v1109_v47  ;;  %786 = vmatprep.mubr.bf16.mxu0 %v214_v53 }
  0x24   :  { %747 = vmatmul.mubr.bf16.vlgmr.msra.gmra.mxu1 %v215_v49  ;;  %1001 = vmatprep.subr.bf16.mxu0 %v1112_v50 }
  0x25   :  { %1022 = vmatpush3.bf16.msra.mxu1 %v1111_v52  ;;  %826 = vmatprep.mubr.bf16.mxu1 %v218_v56 }
  0x26   :  { %1023 = vmatprep.subr.bf16.mxu1 %v1114_v54 }
  0x27   :  { %1002 = vmatpush3.bf16.msra.mxu0 %v1113_v55 }
  0x28   :  { %1003 = vmatprep.subr.bf16.mxu0 %v1116_v57 }
  0x29   :  { %1024 = vmatpush3.bf16.msra.mxu1 %v1115_v58 }
  0x2a   :  { %1025 = vmatprep.subr.bf16.mxu1 %v1118_v59 }
  0x2b   :  { %1004 = vmatpush3.bf16.msra.mxu0 %v1117_v60 }
  0x2c   :  { %1005 = vmatprep.subr.bf16.mxu0 %v1120_v61 }
  0x2d   :  { %1026 = vmatpush3.bf16.msra.mxu1 %v1119_v62 }
  0x2e   :  { %1027 = vmatprep.subr.bf16.mxu1 %v1122_v63 }
  0x2f   :  { %1006 = vmatpush3.bf16.msra.mxu0 %v1121_v0 }
  0x30   :  { %1007 = vmatprep.subr.bf16.mxu0 %v1124_v1 }
  0x31   :  { %1028 = vmatpush3.bf16.msra.mxu1 %v1123_v2 }
  0x32   :  { %1029 = vmatprep.subr.bf16.mxu1 %v1126_v3 }
  0x33   :  { %1008 = vmatpush3.bf16.msra.mxu0 %v1125_v4 }
  0x34   :  { %1009 = vmatprep.subr.bf16.mxu0 %v1128_v5 }
  0x35   :  { %1030 = vmatpush3.bf16.msra.mxu1 %v1127_v6 }
  0x36   :  { %1031 = vmatprep.subr.bf16.mxu1 %v1130_v7 }
  0x37   :  { %1010 = vmatpush3.bf16.msra.mxu0 %v1129_v8 }
  0x38   :  { %1011 = vmatprep.subr.bf16.mxu0 %v1132_v9 }
  0x39   :  { %1032 = vmatpush3.bf16.msra.mxu1 %v1131_v10 }
  0x3a   :  { %1033 = vmatprep.subr.bf16.mxu1 %v1134_v11 }
  0x3b   :  { %1012 = vmatpush3.bf16.msra.mxu0 %v1133_v12 }
  0x3c   :  { %1013 = vmatprep.subr.bf16.mxu0 %v1136_v13 }
  0x3d   :  { %1034 = vmatpush3.bf16.msra.mxu1 %v1135_v14 }
  0x3e   :  { %1035 = vmatprep.subr.bf16.mxu1 %v1138_v15 }
  0x3f   :  { %1014 = vmatpush3.bf16.msra.mxu0 %v1137_v16 }
  0x40   :  { %1052 = vmatprep.subr.bf16.mxu0 %v1149_v20 }
  0x41   :  { %1036 = vmatpush3.bf16.msra.mxu1 %v1139_v18 }
  0x42   :  { %787 = vmatmul.mubr.bf16.vlgmr.msra.gmra.mxu0 %v200_v17 }
  0x43   :  { %1053 = vmatpush3.bf16.msra.mxu0 %v1140_v19  ;;  %1068 = vmatprep.mubr.msk.bf16.mxu0 %vm1150_vm0, %v1149_v20 }
  0x44   :  { %827 = vmatmul.mubr.bf16.vlgmr.msra.gmra.mxu1 %v216_v21  ;;  %1054 = vmatprep.subr.bf16.mxu0 %v1149_v20 }
  0x47   :  { %1055 = vmatpush3.bf16.msra.mxu0 %v1141_v22 }
  0x48   :  { %1056 = vmatprep.subr.bf16.mxu0 %v1149_v20 }
  0x4b   :  { %1057 = vmatpush3.bf16.msra.mxu0 %v1142_v25 }
  0x4c   :  { %1058 = vmatprep.subr.bf16.mxu0 %v1149_v20 }
  0x4f   :  { %1059 = vmatpush3.bf16.msra.mxu0 %v1143_v26 }
  0x50   :  { %1060 = vmatprep.subr.bf16.mxu0 %v1149_v20 }
  0x53   :  { %1061 = vmatpush3.bf16.msra.mxu0 %v1144_v27 }
  0x54   :  { %1062 = vmatprep.subr.bf16.mxu0 %v1149_v20 }
  0x57   :  { %1063 = vmatpush3.bf16.msra.mxu0 %v1145_v28 }
  0x58   :  { %1064 = vmatprep.subr.bf16.mxu0 %v1149_v20 }
  0x5b   :  { %1065 = vmatpush3.bf16.msra.mxu0 %v1146_v29 }
  0x5c   :  { %1066 = vmatprep.subr.bf16.mxu0 %v1149_v20 }
  0x5f   :  { %1067 = vmatpush3.bf16.msra.mxu0 %v1147_v30 }
  0x62   :  { %1069 = vmatmul.mubr.bf16.vlgmr.msra.gmra.mxu0 %v232_v24 }
  0xe2   :  { %v971_v31 = vpop.f32.mrf.mxu0 }
  0xe4   :  { %v972_v32 = vpop.f32.mrf.mxu0  ;;  %v993_v33 = vpop.f32.mrf.mxu1 }
  0xe5   :  { %v973_v47 = vadd.f32 %v972_v32, %v971_v31 }
  0xe6   :  { %v974_v34 = vpop.f32.mrf.mxu0  ;;  %v994_v35 = vpop.f32.mrf.mxu1 }
  0xe7   :  { %v709_v49 = vadd.f32 %v973_v47, %v881_v48  ;;  %v995_v50 = vadd.f32 %v994_v35, %v993_v33 }
  0xe8   :  { %v975_v36 = vpop.f32.mrf.mxu0  ;;  %v996_v37 = vpop.f32.mrf.mxu1 }
  0xe9   :  { %v749_v52 = vadd.f32 %v995_v50, %v709_v49 }
  0xea   :  { %v997_v38 = vpop.f32.mrf.mxu1 }
 0x102   :  { %v1015_v39 = vpop.f32.mrf.mxu0 }
 0x104   :  { %v1016_v40 = vpop.f32.mrf.mxu0  ;;  %v1037_v41 = vpop.f32.mrf.mxu1 }
 0x105   :  { %v1017_v51 = vadd.f32 %v1016_v40, %v1015_v39 }
 0x106   :  { %v1018_v42 = vpop.f32.mrf.mxu0  ;;  %v1038_v43 = vpop.f32.mrf.mxu1 }
 0x107   :  { %v789_v53 = vadd.f32 %v1017_v51, %v749_v52  ;;  %v1039_v54 = vadd.f32 %v1038_v43, %v1037_v41 }
 0x108   :  { %v1019_v44 = vpop.f32.mrf.mxu0  ;;  %v1040_v45 = vpop.f32.mrf.mxu1 }
 0x109   :  { %v829_v55 = vadd.f32 %v1039_v54, %v789_v53 }
 0x10a   :  { %v1041_v46 = vpop.f32.mrf.mxu1 }
 0x122   :  { %v868_v56 = vpop.f32.mrf.mxu0 }
 0x123   :  { %v869_v57 = vadd.f32 %v868_v56, %v829_v55 }
 0x124   :  { %v1070_v58 = vpop.f32.mrf.mxu0 }
 0x125   :  { %v874_v59 = vmax.f32 %v869_v57, 0.0 }
 0x126   :  { %v871_v60 = vpop.f32.mrf.mxu0 }
 0x127   :  { %v875_v61 = vpack.c.bf16 %v874_v59, %v874_v59 }
 0x128   :  { %v1071_v62 = vpop.f32.mrf.mxu0 }
 0x129   :  { %876 = vst [vmem:[%s1416_s3] sm:$0x1] %v875_v61 }

// kernel: dqn_forward.7
= control target key start
LH: loop header
LB: loop body
LE: loop exit
PB: predicated region body
PF: predicated region fallthrough
CT: control target
= control target key end

     0   :  { %v898_v2 = vmov 0   ;;  %s1134_s0 = inlined_call_operand.vmem [shape: bf16[2,128], index: 0, kind: input, shape index: {}]   ;;  %s1135_s1 = inlined_call_operand.vmem [shape: bf16[128,512], index: 1, kind: input, shape index: {}]   ;;  %s1136_s2 = inlined_call_operand.vmem [shape: f32[1,512], index: 2, kind: input, shape index: {}]   ;;  %s1137_s3 = inlined_call_operand.vmem [shape: bf16[512,128], index: 3, kind: input, shape index: {}]   ;;  %s1138_s4 = inlined_call_operand.vmem [shape: f32[1,128], index: 4, kind: input, shape index: {}]   ;;  %s1139_s5 = inlined_call_operand.hbm [shape: f32[2,128], index: 5, kind: output, shape index: {}]  }
   0x1   :  { %v796_v0 = vld [vmem:[%s1135_s1 + $0xe4] ss:$16 sps:$4 sm:$0xff]   ;;  %v798_v1 = vld [vmem:[%s1135_s1 + $0xec] ss:$16 sps:$4 sm:$0xff]   ;;  %269 = vmatprep.mubr.bf16.mxu0 %v898_v2  ;;  %310 = vmatprep.mubr.bf16.mxu1 %v898_v2  ;;  %v800_v3 = vld [vmem:[%s1135_s1 + $0xe0] ss:$16 sps:$4 sm:$0xff]  }
   0x2   :  { %237 = vmatprep.subr.bf16.mxu0 %v796_v0  ;;  %v801_v4 = vld [vmem:[%s1135_s1 + $0xe8] ss:$16 sps:$4 sm:$0xff]   ;;  %278 = vmatprep.subr.bf16.mxu1 %v798_v1  ;;  %v802_v5 = vld [vmem:[%s1135_s1 + $0xc4] ss:$16 sps:$4 sm:$0xff]   ;;  %v804_v6 = vld [vmem:[%s1135_s1 + $0xcc] ss:$16 sps:$4 sm:$0xff]  }
   0x3   :  { %238 = vmatpush1.bf16.msra.mxu0 %v800_v3  ;;  %279 = vmatpush1.bf16.msra.mxu1 %v801_v4  ;;  %v806_v7 = vld [vmem:[%s1135_s1 + $0xc0] ss:$16 sps:$4 sm:$0xff]   ;;  %v807_v8 = vld [vmem:[%s1135_s1 + $0xc8] ss:$16 sps:$4 sm:$0xff]   ;;  %v808_v9 = vld [vmem:[%s1135_s1 + $0xa4] ss:$16 sps:$4 sm:$0xff]  }
   0x4   :  { %239 = vmatprep.subr.bf16.mxu0 %v802_v5  ;;  %280 = vmatprep.subr.bf16.mxu1 %v804_v6  ;;  %v810_v10 = vld [vmem:[%s1135_s1 + $0xac] ss:$16 sps:$4 sm:$0xff]   ;;  %v812_v11 = vld [vmem:[%s1135_s1 + $0xa0] ss:$16 sps:$4 sm:$0xff]   ;;  %v813_v12 = vld [vmem:[%s1135_s1 + $0xa8] ss:$16 sps:$4 sm:$0xff]  }
   0x5   :  { %v814_v13 = vld [vmem:[%s1135_s1 + $0x84] ss:$16 sps:$4 sm:$0xff]   ;;  %v816_v14 = vld [vmem:[%s1135_s1 + $0x8c] ss:$16 sps:$4 sm:$0xff]   ;;  %v818_v15 = vld [vmem:[%s1135_s1 + $0x80] ss:$16 sps:$4 sm:$0xff]  }
   0x6   :  { %v819_v16 = vld [vmem:[%s1135_s1 + $0x88] ss:$16 sps:$4 sm:$0xff]   ;;  %v820_v17 = vld [vmem:[%s1135_s1 + $0x64] ss:$16 sps:$4 sm:$0xff]   ;;  %v822_v18 = vld [vmem:[%s1135_s1 + $0x6c] ss:$16 sps:$4 sm:$0xff]  }
   0x7   :  { %240 = vmatpush1.bf16.msra.mxu0 %v806_v7  ;;  %281 = vmatpush1.bf16.msra.mxu1 %v807_v8  ;;  %v824_v19 = vld [vmem:[%s1135_s1 + $0x60] ss:$16 sps:$4 sm:$0xff]   ;;  %v825_v20 = vld [vmem:[%s1135_s1 + $0x68] ss:$16 sps:$4 sm:$0xff]   ;;  %v826_v21 = vld [vmem:[%s1135_s1 + $0x44] ss:$16 sps:$4 sm:$0xff]  }
   0x8   :  { %241 = vmatprep.subr.bf16.mxu0 %v808_v9  ;;  %282 = vmatprep.subr.bf16.mxu1 %v810_v10  ;;  %v828_v22 = vld [vmem:[%s1135_s1 + $0x4c] ss:$16 sps:$4 sm:$0xff]   ;;  %v830_v23 = vld [vmem:[%s1135_s1 + $0x40] ss:$16 sps:$4 sm:$0xff]   ;;  %v831_v24 = vld [vmem:[%s1135_s1 + $0x48] ss:$16 sps:$4 sm:$0xff]  }
   0x9   :  { %v832_v25 = vld [vmem:[%s1135_s1 + $0x24] ss:$16 sps:$4 sm:$0xff]   ;;  %v834_v26 = vld [vmem:[%s1135_s1 + $0x2c] ss:$16 sps:$4 sm:$0xff]   ;;  %v836_v27 = vld [vmem:[%s1135_s1 + $0x20] ss:$16 sps:$4 sm:$0xff]  }
   0xa   :  { %v837_v28 = vld [vmem:[%s1135_s1 + $0x28] ss:$16 sps:$4 sm:$0xff]   ;;  %v838_v29 = vld [vmem:[%s1135_s1 + $0x4] ss:$16 sps:$4 sm:$0xff]   ;;  %v840_v30 = vld [vmem:[%s1135_s1 + $0xc] ss:$16 sps:$4 sm:$0xff]  }
   0xb   :  { %242 = vmatpush1.bf16.msra.mxu0 %v812_v11  ;;  %283 = vmatpush1.bf16.msra.mxu1 %v813_v12  ;;  %v842_v31 = vld [vmem:[%s1135_s1] ss:$16 sps:$4 sm:$0xff]   ;;  %v843_v32 = vld [vmem:[%s1135_s1 + $0x8] ss:$16 sps:$4 sm:$0xff]  }
   0xc   :  { %243 = vmatprep.subr.bf16.mxu0 %v814_v13  ;;  %284 = vmatprep.subr.bf16.mxu1 %v816_v14  ;;  %v844_v33 = vld [vmem:[%s1137_s3 + $0x78] sm:$0xff]   ;;  %v22_v35 = vld [vmem:[%s1134_s0] sm:$0x1]  ;;  %v848_v38 = vld [vmem:[%s1137_s3 + $0x70] sm:$0xff]  }
   0xd   :  { %v845_v34 = vld [vmem:[%s1137_s3 + $0xf8] sm:$0xff]   ;;  %v849_v39 = vld [vmem:[%s1137_s3 + $0xf0] sm:$0xff]   ;;  %v852_v42 = vld [vmem:[%s1137_s3 + $0x68] sm:$0xff]  }
   0xe   :  { %v846_v36 = vld [vmem:[%s1137_s3 + $0x38] sm:$0xff]   ;;  %v850_v40 = vld [vmem:[%s1137_s3 + $0x30] sm:$0xff]   ;;  %v853_v43 = vld [vmem:[%s1137_s3 + $0xe8] sm:$0xff]  }
   0xf   :  { %244 = vmatpush1.bf16.msra.mxu0 %v818_v15  ;;  %285 = vmatpush1.bf16.msra.mxu1 %v819_v16  ;;  %v847_v37 = vld [vmem:[%s1137_s3 + $0xb8] sm:$0xff]   ;;  %v851_v41 = vld [vmem:[%s1137_s3 + $0xb0] sm:$0xff]   ;;  %v854_v44 = vld [vmem:[%s1137_s3 + $0x28] sm:$0xff]  }
  0x10   :  { %245 = vmatprep.subr.bf16.mxu0 %v820_v17  ;;  %286 = vmatprep.subr.bf16.mxu1 %v822_v18  ;;  %v855_v45 = vld [vmem:[%s1137_s3 + $0xa8] sm:$0xff]   ;;  %v856_v46 = vld [vmem:[%s1137_s3 + $0x60] sm:$0xff]   ;;  %v860_v50 = vld [vmem:[%s1137_s3 + $0x58] sm:$0xff]  }
  0x11   :  { %v857_v47 = vld [vmem:[%s1137_s3 + $0xe0] sm:$0xff]   ;;  %v861_v51 = vld [vmem:[%s1137_s3 + $0xd8] sm:$0xff]   ;;  %v864_v54 = vld [vmem:[%s1137_s3 + $0x50] sm:$0xff]  }
  0x12   :  { %v858_v48 = vld [vmem:[%s1137_s3 + $0x20] sm:$0xff]   ;;  %v862_v52 = vld [vmem:[%s1137_s3 + $0x18] sm:$0xff]   ;;  %v865_v55 = vld [vmem:[%s1137_s3 + $0xd0] sm:$0xff]  }
  0x13   :  { %246 = vmatpush1.bf16.msra.mxu0 %v824_v19  ;;  %287 = vmatpush1.bf16.msra.mxu1 %v825_v20  ;;  %v859_v49 = vld [vmem:[%s1137_s3 + $0xa0] sm:$0xff]   ;;  %v863_v53 = vld [vmem:[%s1137_s3 + $0x98] sm:$0xff]  }
  0x14   :  { %247 = vmatprep.subr.bf16.mxu0 %v826_v21  ;;  %288 = vmatprep.subr.bf16.mxu1 %v828_v22 }
  0x17   :  { %248 = vmatpush1.bf16.msra.mxu0 %v830_v23  ;;  %289 = vmatpush1.bf16.msra.mxu1 %v831_v24 }
  0x18   :  { %249 = vmatprep.subr.bf16.mxu0 %v832_v25  ;;  %290 = vmatprep.subr.bf16.mxu1 %v834_v26 }
  0x1b   :  { %250 = vmatpush1.bf16.msra.mxu0 %v836_v27  ;;  %291 = vmatpush1.bf16.msra.mxu1 %v837_v28 }
  0x1c   :  { %251 = vmatprep.subr.bf16.mxu0 %v838_v29  ;;  %292 = vmatprep.subr.bf16.mxu1 %v840_v30 }
  0x1f   :  { %252 = vmatpush1.bf16.msra.mxu0 %v842_v31  ;;  %293 = vmatpush1.bf16.msra.mxu1 %v843_v32 }
  0x20   :  { %750 = vmatprep.subr.bf16.mxu0 %v844_v33  ;;  %772 = vmatprep.subr.bf16.mxu1 %v845_v34 }
  0x22   :  { %270 = vmatmul.mubr.bf16.vlgmr.msra.gmra.mxu0 %v22_v35  ;;  %311 = vmatmul.mubr.bf16.vlgmr.msra.gmra.mxu1 %v22_v35 }
  0x23   :  { %751 = vmatpush3.bf16.msra.mxu0 %v846_v36  ;;  %773 = vmatpush3.bf16.msra.mxu1 %v847_v37 }
  0x24   :  { %752 = vmatprep.subr.bf16.mxu0 %v848_v38  ;;  %774 = vmatprep.subr.bf16.mxu1 %v849_v39 }
  0x27   :  { %753 = vmatpush3.bf16.msra.mxu0 %v850_v40  ;;  %775 = vmatpush3.bf16.msra.mxu1 %v851_v41 }
  0x28   :  { %754 = vmatprep.subr.bf16.mxu0 %v852_v42  ;;  %776 = vmatprep.subr.bf16.mxu1 %v853_v43 }
  0x2b   :  { %755 = vmatpush3.bf16.msra.mxu0 %v854_v44  ;;  %777 = vmatpush3.bf16.msra.mxu1 %v855_v45 }
  0x2c   :  { %756 = vmatprep.subr.bf16.mxu0 %v856_v46  ;;  %778 = vmatprep.subr.bf16.mxu1 %v857_v47 }
  0x2f   :  { %757 = vmatpush3.bf16.msra.mxu0 %v858_v48  ;;  %779 = vmatpush3.bf16.msra.mxu1 %v859_v49 }
  0x30   :  { %758 = vmatprep.subr.bf16.mxu0 %v860_v50  ;;  %780 = vmatprep.subr.bf16.mxu1 %v861_v51 }
  0x31   :  { %10 = vsyncpa [#allocation3], 0  ;;  %v866_v56 = vld [vmem:[%s1137_s3 + $0x10] sm:$0xff]   ;;  %v868_v58 = vld [vmem:[%s1137_s3 + $0x48] sm:$0xff]   ;;  %v57_v2 = vlaneseq  ;;  %s899_s0 = smov [#allocation2]  }
  0x32   :  { %v867_v57 = vld [vmem:[%s1137_s3 + $0x90] sm:$0xff]   ;;  %v869_v59 = vld [vmem:[%s1137_s3 + $0xc8] sm:$0xff]   ;;  %v872_v62 = vld [vmem:[%s1137_s3 + $0x40] sm:$0xff]   ;;  %s677_s20 = sshll.u32 %s899_s0, 4  ;;  %s678_s20 = int_to_ptr.vmem [resolvable:$true] %s677_s20 }
  0x33   :  { %759 = vmatpush3.bf16.msra.mxu0 %v862_v52  ;;  %781 = vmatpush3.bf16.msra.mxu1 %v863_v53  ;;  %v870_v60 = vld [vmem:[%s1137_s3 + $0x8] sm:$0xff]   ;;  %v873_v63 = vld [vmem:[%s1137_s3 + $0xc0] sm:$0xff]   ;;  %v58_v3 = vshrl.u32 %v57_v2, 7  ;;  %s876_s21 = scalar_lea.vmem %s678_s20, 32  ;;  %p881_p1 = scmp.lt.s32.totalorder %s678_s20, %s678_s20 }
  0x34   :  { %760 = vmatprep.subr.bf16.mxu0 %v864_v54  ;;  %782 = vmatprep.subr.bf16.mxu1 %v865_v55  ;;  %v871_v61 = vld [vmem:[%s1137_s3 + $0x88] sm:$0xff]   ;;  %v874_v0 = vld [vmem:[%s1137_s3] sm:$0xff]   ;;  %p877_p0 = scmp.ne.s32.totalorder %s678_s20, %s876_s21  ;;  %p882_p2 = scmp.lt.s32.totalorder %s876_s21, %s876_s21 }
  0x35   :  { %v875_v1 = vld [vmem:[%s1137_s3 + $0x80] sm:$0xff]   ;;  %v59_v4 = vsub.s32 0, %v58_v3  ;;  %v67_v5 = vsub.s32 2, %v58_v3  ;;  %v63_v7 = vsub.s32 1, %v58_v3  ;;  %v71_v8 = vsub.s32 3, %v58_v3 }
  0x36   :  { %v55_v6 = vld [vmem:[%s1136_s2] sm:$0xf]  ;;  %p883_p3 = por %p882_p2, %p881_p1 }
  0x37   :  { %761 = vmatpush3.bf16.msra.mxu0 %v866_v56  ;;  %783 = vmatpush3.bf16.msra.mxu1 %v867_v57  ;;  %v60_v9 = vrot.slane %v55_v6, %v59_v4  ;;  %v68_v10 = vrot.slane %v55_v6, %v67_v5  ;;  %v64_v11 = vrot.slane %v55_v6, %v63_v7  ;;  %v717_v35 = vld [vmem:[%s1138_s4] ss:$0 sm:$0xff] }
  0x38   :  { %762 = vmatprep.subr.bf16.mxu0 %v868_v58  ;;  %784 = vmatprep.subr.bf16.mxu1 %v869_v59  ;;  %v72_v12 = vrot.slane %v55_v6, %v71_v8  ;;  %p884_p4 = pnand %p883_p3, %p877_p0 }
  0x3b   :  { %763 = vmatpush3.bf16.msra.mxu0 %v870_v60  ;;  %785 = vmatpush3.bf16.msra.mxu1 %v871_v61 }
  0x3c   :  { %764 = vmatprep.subr.bf16.mxu0 %v872_v62  ;;  %786 = vmatprep.subr.bf16.mxu1 %v873_v63 }
  0x3f   :  { %765 = vmatpush3.bf16.msra.mxu0 %v874_v0  ;;  %787 = vmatpush3.bf16.msra.mxu1 %v875_v1 }
  0xe2   :  { %v271_v13 = vpop.f32.mrf.mxu0  ;;  %v312_v14 = vpop.f32.mrf.mxu1 }
  0xe3   :  { %v272_v15 = vadd.f32 %v271_v13, %v60_v9  ;;  %v313_v16 = vadd.f32 %v312_v14, %v68_v10 }
  0xe4   :  { %v273_v17 = vpop.f32.mrf.mxu0  ;;  %v314_v18 = vpop.f32.mrf.mxu1 }
  0xe5   :  { %v321_v19 = vmax.f32 %v313_v16, 0.0  ;;  %v274_v20 = vadd.f32 %v273_v17, %v64_v11  ;;  %v315_v21 = vadd.f32 %v314_v18, %v72_v12  ;;  %v319_v22 = vmax.f32 %v272_v15, 0.0 }
  0xe6   :  { %v275_v23 = vpop.f32.mrf.mxu0  ;;  %v316_v24 = vpop.f32.mrf.mxu1 }
  0xe7   :  { %v320_v25 = vmax.f32 %v274_v20, 0.0  ;;  %v322_v26 = vmax.f32 %v315_v21, 0.0  ;;  %v325_v27 = vpack.c.bf16 %v321_v19, %v321_v19  ;;  %v323_v32 = vpack.c.bf16 %v319_v22, %v319_v22 }
  0xe8   :  { %v276_v28 = vpop.f32.mrf.mxu0  ;;  %v317_v29 = vpop.f32.mrf.mxu1 }
  0xe9   :  { %v324_v30 = vpack.c.bf16 %v320_v25, %v320_v25  ;;  %v326_v31 = vpack.c.bf16 %v322_v26, %v322_v26 }
  0xeb   :  { %622 = vmatprep.mubr.bf16.mxu0 %v324_v30  ;;  %662 = vmatprep.mubr.bf16.mxu1 %v326_v31 }
  0xec   :  { %623 = vmatmul.mubr.bf16.vlgmr.msra.gmra.mxu0 %v323_v32  ;;  %663 = vmatmul.mubr.bf16.vlgmr.msra.gmra.mxu1 %v325_v27 }
 0x1ac   :  { %v766_v33 = vpop.f32.mrf.mxu0  ;;  %v788_v34 = vpop.f32.mrf.mxu1 }
 0x1ae   :  { %v767_v36 = vpop.f32.mrf.mxu0  ;;  %v789_v37 = vpop.f32.mrf.mxu1 }
 0x1af   :  { %v768_v38 = vadd.f32 %v767_v36, %v766_v33  ;;  %v790_v42 = vadd.f32 %v789_v37, %v788_v34 }
 0x1b0   :  { %v769_v39 = vpop.f32.mrf.mxu0  ;;  %v791_v40 = vpop.f32.mrf.mxu1 }
 0x1b1   :  { %v625_v41 = vadd.f32 %v768_v38, %v717_v35 }
 0x1b2   :  { %v770_v43 = vpop.f32.mrf.mxu0  ;;  %v792_v44 = vpop.f32.mrf.mxu1 }
 0x1b3   :  { %v665_v45 = vadd.f32 %v790_v42, %v625_v41 }
 0x1b5   :  { %670 = vst [vmem:[#allocation2] sm:$0x3] %v665_v45 }
 0x1b6   :  { %887 = shalt.err (!%p884_p4)
}
 0x1b7   :  { %680 = dma.vmem_to_hbm [thread:$0]  %s678_s20, 32, %s1139_s5, [#allocation3]  }
 0x1b8   :  { %896 = dma.done.wait [#allocation3], 32  }
 0x1b9   :  { %897 = vsyncadd [#allocation3], 4294967264 }
 0x1ba   :  { %684 = vsyncpa [#allocation3], 1 }

// kernel: dqn_forward.5
= control target key start
LH: loop header
LB: loop body
LE: loop exit
PB: predicated region body
PF: predicated region fallthrough
CT: control target
= control target key end

     0   :  { %s2638_s1 = inlined_call_operand.vmem [shape: bf16[2048,128], index: 1, kind: input, shape index: {}]   ;;  %s2639_s0 = inlined_call_operand.vmem [shape: bf16[18,2048], index: 0, kind: input, shape index: {}]   ;;  %s2640_s2 = inlined_call_operand.vmem [shape: f32[1,128], index: 2, kind: input, shape index: {}]   ;;  %s2641_s3 = inlined_call_operand.vmem [shape: bf16[18,128], index: 3, kind: output, shape index: {}]  }
   0x1   :  { %v2009_v0 = vld [vmem:[%s2638_s1 + $0x78] sm:$0xff]   ;;  %v2013_v4 = vld [vmem:[%s2638_s1 + $0x70] sm:$0xff]   ;;  %v2017_v8 = vld [vmem:[%s2638_s1 + $0x68] sm:$0xff]  }
   0x2   :  { %v2010_v1 = vld [vmem:[%s2638_s1 + $0xf8] sm:$0xff]   ;;  %1785 = vmatprep.subr.bf16.mxu0 %v2009_v0  ;;  %v2014_v5 = vld [vmem:[%s2638_s1 + $0xf0] sm:$0xff]   ;;  %v2018_v9 = vld [vmem:[%s2638_s1 + $0xe8] sm:$0xff]  }
   0x3   :  { %v2011_v2 = vld [vmem:[%s2638_s1 + $0x38] sm:$0xff]   ;;  %1813 = vmatprep.subr.bf16.mxu1 %v2010_v1  ;;  %v2015_v6 = vld [vmem:[%s2638_s1 + $0x30] sm:$0xff]   ;;  %v2019_v10 = vld [vmem:[%s2638_s1 + $0x28] sm:$0xff]  }
   0x4   :  { %v2012_v3 = vld [vmem:[%s2638_s1 + $0xb8] sm:$0xff]   ;;  %1786 = vmatpush3.bf16.msra.mxu0 %v2011_v2  ;;  %v2016_v7 = vld [vmem:[%s2638_s1 + $0xb0] sm:$0xff]   ;;  %v2020_v11 = vld [vmem:[%s2638_s1 + $0xa8] sm:$0xff]  }
   0x5   :  { %1814 = vmatpush3.bf16.msra.mxu1 %v2012_v3  ;;  %1787 = vmatprep.subr.bf16.mxu0 %v2013_v4  ;;  %v2021_v12 = vld [vmem:[%s2638_s1 + $0x60] sm:$0xff]   ;;  %v2025_v16 = vld [vmem:[%s2638_s1 + $0x58] sm:$0xff]   ;;  %v2029_v20 = vld [vmem:[%s2638_s1 + $0x50] sm:$0xff]  }
   0x6   :  { %1815 = vmatprep.subr.bf16.mxu1 %v2014_v5  ;;  %v2022_v13 = vld [vmem:[%s2638_s1 + $0xe0] sm:$0xff]   ;;  %v2026_v17 = vld [vmem:[%s2638_s1 + $0xd8] sm:$0xff]   ;;  %v2030_v21 = vld [vmem:[%s2638_s1 + $0xd0] sm:$0xff]  }
   0x7   :  { %v2023_v14 = vld [vmem:[%s2638_s1 + $0x20] sm:$0xff]   ;;  %v2027_v18 = vld [vmem:[%s2638_s1 + $0x18] sm:$0xff]   ;;  %v2031_v22 = vld [vmem:[%s2638_s1 + $0x10] sm:$0xff]  }
   0x8   :  { %1788 = vmatpush3.bf16.msra.mxu0 %v2015_v6  ;;  %v2024_v15 = vld [vmem:[%s2638_s1 + $0xa0] sm:$0xff]   ;;  %v2028_v19 = vld [vmem:[%s2638_s1 + $0x98] sm:$0xff]   ;;  %v2032_v23 = vld [vmem:[%s2638_s1 + $0x90] sm:$0xff]  }
   0x9   :  { %1816 = vmatpush3.bf16.msra.mxu1 %v2016_v7  ;;  %1789 = vmatprep.subr.bf16.mxu0 %v2017_v8  ;;  %v2033_v24 = vld [vmem:[%s2638_s1 + $0x48] sm:$0xff]   ;;  %v2037_v28 = vld [vmem:[%s2638_s1 + $0x40] sm:$0xff]   ;;  %v2041_v40 = vld [vmem:[%s2638_s1 + $0x178] sm:$0xff]  }
   0xa   :  { %1817 = vmatprep.subr.bf16.mxu1 %v2018_v9  ;;  %v2034_v25 = vld [vmem:[%s2638_s1 + $0xc8] sm:$0xff]   ;;  %v2038_v29 = vld [vmem:[%s2638_s1 + $0xc0] sm:$0xff]   ;;  %v2042_v41 = vld [vmem:[%s2638_s1 + $0x1f8] sm:$0xff]  }
   0xb   :  { %v2035_v26 = vld [vmem:[%s2638_s1 + $0x8] sm:$0xff]   ;;  %v2039_v30 = vld [vmem:[%s2638_s1] sm:$0xff]   ;;  %v2043_v42 = vld [vmem:[%s2638_s1 + $0x138] sm:$0xff]  }
   0xc   :  { %1790 = vmatpush3.bf16.msra.mxu0 %v2019_v10  ;;  %v2036_v27 = vld [vmem:[%s2638_s1 + $0x88] sm:$0xff]   ;;  %v2040_v31 = vld [vmem:[%s2638_s1 + $0x80] sm:$0xff]   ;;  %v2044_v43 = vld [vmem:[%s2638_s1 + $0x1b8] sm:$0xff]  }
   0xd   :  { %1818 = vmatpush3.bf16.msra.mxu1 %v2020_v11  ;;  %1791 = vmatprep.subr.bf16.mxu0 %v2021_v12  ;;  %v15_v32 = vld [vmem:[%s2639_s0] sm:$0xff]  ;;  %v16_v34 = vld [vmem:[%s2639_s0 + $0x8] sm:$0xff]  ;;  %v2045_v44 = vld [vmem:[%s2638_s1 + $0x170] sm:$0xff]  }
   0xe   :  { %1819 = vmatprep.subr.bf16.mxu1 %v2022_v13  ;;  %v23_v33 = vld [vmem:[%s2639_s0 + $0x40] sm:$0xff]  ;;  %v24_v37 = vld [vmem:[%s2639_s0 + $0x48] sm:$0xff]  ;;  %v2046_v45 = vld [vmem:[%s2638_s1 + $0x1f0] sm:$0xff]  }
   0xf   :  { %v1614_v35 = vcombine.low %v15_v32, %v23_v33  ;;  %v1615_v36 = vcombine.high %v15_v32, %v23_v33  ;;  %v1616_v38 = vcombine.low %v16_v34, %v24_v37  ;;  %v1617_v39 = vcombine.high %v16_v34, %v24_v37  ;;  %v2047_v46 = vld [vmem:[%s2638_s1 + $0x130] sm:$0xff]   ;;  %v2049_v48 = vld [vmem:[%s2638_s1 + $0x168] sm:$0xff]   ;;  %v2053_v52 = vld [vmem:[%s2638_s1 + $0x160] sm:$0xff]  }
  0x10   :  { %1792 = vmatpush3.bf16.msra.mxu0 %v2023_v14  ;;  %v2048_v47 = vld [vmem:[%s2638_s1 + $0x1b0] sm:$0xff]   ;;  %v2050_v49 = vld [vmem:[%s2638_s1 + $0x1e8] sm:$0xff]   ;;  %v2054_v53 = vld [vmem:[%s2638_s1 + $0x1e0] sm:$0xff]  }
  0x11   :  { %1820 = vmatpush3.bf16.msra.mxu1 %v2024_v15  ;;  %1793 = vmatprep.subr.bf16.mxu0 %v2025_v16  ;;  %v2051_v50 = vld [vmem:[%s2638_s1 + $0x128] sm:$0xff]   ;;  %v2055_v54 = vld [vmem:[%s2638_s1 + $0x120] sm:$0xff]   ;;  %v2057_v56 = vld [vmem:[%s2638_s1 + $0x158] sm:$0xff]  }
  0x12   :  { %1821 = vmatprep.subr.bf16.mxu1 %v2026_v17  ;;  %1238 = vmatprep.mubr.bf16.mxu0 %v1615_v36  ;;  %v2052_v51 = vld [vmem:[%s2638_s1 + $0x1a8] sm:$0xff]   ;;  %v2056_v55 = vld [vmem:[%s2638_s1 + $0x1a0] sm:$0xff]   ;;  %v2058_v57 = vld [vmem:[%s2638_s1 + $0x1d8] sm:$0xff]  }
  0x13   :  { %1286 = vmatprep.mubr.bf16.mxu1 %v1617_v39  ;;  %v2059_v58 = vld [vmem:[%s2638_s1 + $0x118] sm:$0xff]   ;;  %v31_v60 = vld [vmem:[%s2639_s0 + $0x80] sm:$0x11]  ;;  %v32_v61 = vld [vmem:[%s2639_s0 + $0x88] sm:$0x11] }
  0x14   :  { %1794 = vmatpush3.bf16.msra.mxu0 %v2027_v18  ;;  %v2060_v59 = vld [vmem:[%s2638_s1 + $0x198] sm:$0xff]   ;;  %v1631_v62 = vcombine.high %v31_v60, %v31_v60  ;;  %v1630_v63 = vcombine.low %v31_v60, %v31_v60  ;;  %v1633_v0 = vcombine.high %v32_v61, %v32_v61  ;;  %v2064_v1 = vld [vmem:[%s2638_s1 + $0x150] sm:$0xff]   ;;  %v1632_v2 = vcombine.low %v32_v61, %v32_v61  ;;  %v2069_v6 = vld [vmem:[%s2638_s1 + $0x148] sm:$0xff]  }
  0x15   :  { %1822 = vmatpush3.bf16.msra.mxu1 %v2028_v19  ;;  %1795 = vmatprep.subr.bf16.mxu0 %v2029_v20  ;;  %v2065_v3 = vld [vmem:[%s2638_s1 + $0x1d0] sm:$0xff]   ;;  %v2070_v7 = vld [vmem:[%s2638_s1 + $0x1c8] sm:$0xff]   ;;  %v2073_v10 = vld [vmem:[%s2638_s1 + $0x140] sm:$0xff]  }
  0x16   :  { %1823 = vmatprep.subr.bf16.mxu1 %v2030_v21  ;;  %v2067_v4 = vld [vmem:[%s2638_s1 + $0x110] sm:$0xff]   ;;  %v2071_v8 = vld [vmem:[%s2638_s1 + $0x108] sm:$0xff]   ;;  %v2074_v11 = vld [vmem:[%s2638_s1 + $0x1c0] sm:$0xff]  }
  0x17   :  { %v2068_v5 = vld [vmem:[%s2638_s1 + $0x190] sm:$0xff]   ;;  %v2072_v9 = vld [vmem:[%s2638_s1 + $0x188] sm:$0xff]   ;;  %v2075_v12 = vld [vmem:[%s2638_s1 + $0x100] sm:$0xff]  }
  0x18   :  { %1796 = vmatpush3.bf16.msra.mxu0 %v2031_v22  ;;  %v2076_v13 = vld [vmem:[%s2638_s1 + $0x180] sm:$0xff]   ;;  %v17_v14 = vld [vmem:[%s2639_s0 + $0x10] sm:$0xff]  ;;  %v18_v16 = vld [vmem:[%s2639_s0 + $0x18] sm:$0xff] }
  0x19   :  { %1824 = vmatpush3.bf16.msra.mxu1 %v2032_v23  ;;  %1797 = vmatprep.subr.bf16.mxu0 %v2033_v24  ;;  %v25_v15 = vld [vmem:[%s2639_s0 + $0x50] sm:$0xff]  ;;  %v26_v19 = vld [vmem:[%s2639_s0 + $0x58] sm:$0xff]  ;;  %v2087_v33 = vld [vmem:[%s2638_s1 + $0x268] sm:$0xff]  }
  0x1a   :  { %1825 = vmatprep.subr.bf16.mxu1 %v2034_v25  ;;  %v1618_v17 = vcombine.low %v17_v14, %v25_v15  ;;  %v1619_v18 = vcombine.high %v17_v14, %v25_v15  ;;  %v1620_v20 = vcombine.low %v18_v16, %v26_v19  ;;  %v1621_v21 = vcombine.high %v18_v16, %v26_v19  ;;  %v2077_v22 = vld [vmem:[%s2638_s1 + $0x278] sm:$0xff]   ;;  %v2088_v34 = vld [vmem:[%s2638_s1 + $0x2e8] sm:$0xff]   ;;  %v19_v60 = vld [vmem:[%s2639_s0 + $0x20] sm:$0xff] }
  0x1b   :  { %v2078_v23 = vld [vmem:[%s2638_s1 + $0x2f8] sm:$0xff]   ;;  %v2090_v37 = vld [vmem:[%s2638_s1 + $0x228] sm:$0xff]   ;;  %v27_v61 = vld [vmem:[%s2639_s0 + $0x60] sm:$0xff] }
  0x1c   :  { %1798 = vmatpush3.bf16.msra.mxu0 %v2035_v26  ;;  %v2079_v24 = vld [vmem:[%s2638_s1 + $0x238] sm:$0xff]   ;;  %v2081_v26 = vld [vmem:[%s2638_s1 + $0x270] sm:$0xff]   ;;  %v2091_v39 = vld [vmem:[%s2638_s1 + $0x2a8] sm:$0xff]  }
  0x1d   :  { %1826 = vmatpush3.bf16.msra.mxu1 %v2036_v27  ;;  %1799 = vmatprep.subr.bf16.mxu0 %v2037_v28  ;;  %v2080_v25 = vld [vmem:[%s2638_s1 + $0x2b8] sm:$0xff]   ;;  %v2082_v27 = vld [vmem:[%s2638_s1 + $0x2f0] sm:$0xff]   ;;  %v2123_v15 = vld [vmem:[%s2638_s1 + $0x368] sm:$0xff]  }
  0x1e   :  { %1827 = vmatprep.subr.bf16.mxu1 %v2038_v29  ;;  %v2083_v28 = vld [vmem:[%s2638_s1 + $0x230] sm:$0xff]   ;;  %v2124_v16 = vld [vmem:[%s2638_s1 + $0x3e8] sm:$0xff]  }
  0x1f   :  { %v2084_v29 = vld [vmem:[%s2638_s1 + $0x2b0] sm:$0xff]   ;;  %v2126_v19 = vld [vmem:[%s2638_s1 + $0x328] sm:$0xff]  }
  0x20   :  { %1800 = vmatpush3.bf16.msra.mxu0 %v2039_v30  ;;  %v33_v30 = vld [vmem:[%s2639_s0 + $0x90] sm:$0x11] }
  0x21   :  { %1828 = vmatpush3.bf16.msra.mxu1 %v2040_v31  ;;  %1841 = vmatprep.subr.bf16.mxu0 %v2041_v40  ;;  %v1635_v31 = vcombine.high %v33_v30, %v33_v30  ;;  %v1634_v32 = vcombine.low %v33_v30, %v33_v30  ;;  %v2093_v40 = vld [vmem:[%s2638_s1 + $0x260] sm:$0xff]   ;;  %v2137_v30 = vld [vmem:[%s2638_s1 + $0x350] sm:$0xff]  }
  0x22   :  { %1869 = vmatprep.subr.bf16.mxu1 %v2042_v41  ;;  %v2094_v41 = vld [vmem:[%s2638_s1 + $0x2e0] sm:$0xff]  }
  0x23   :  { %1239 = vmatmul.mubr.bf16.vlgmr.msra.gmra.mxu0 %v1614_v35  ;;  %v34_v35 = vld [vmem:[%s2639_s0 + $0x98] sm:$0x11] }
  0x24   :  { %1287 = vmatmul.mubr.bf16.vlgmr.msra.gmra.mxu1 %v1616_v38  ;;  %1842 = vmatpush3.bf16.msra.mxu0 %v2043_v42  ;;  %v1637_v36 = vcombine.high %v34_v35, %v34_v35  ;;  %v1636_v38 = vcombine.low %v34_v35, %v34_v35  ;;  %v2095_v42 = vld [vmem:[%s2638_s1 + $0x220] sm:$0xff]   ;;  %v2142_v35 = vld [vmem:[%s2638_s1 + $0x3c8] sm:$0xff]  }
  0x25   :  { %1870 = vmatpush3.bf16.msra.mxu1 %v2044_v43  ;;  %1843 = vmatprep.subr.bf16.mxu0 %v2045_v44  ;;  %v2096_v43 = vld [vmem:[%s2638_s1 + $0x2a0] sm:$0xff]   ;;  %v2097_v44 = vld [vmem:[%s2638_s1 + $0x258] sm:$0xff]  }
  0x26   :  { %1871 = vmatprep.subr.bf16.mxu1 %v2046_v45  ;;  %1246 = vmatprep.mubr.bf16.mxu0 %v1631_v62  ;;  %v2098_v45 = vld [vmem:[%s2638_s1 + $0x2d8] sm:$0xff]   ;;  %v20_v62 = vld [vmem:[%s2639_s0 + $0x28] sm:$0xff] }
  0x27   :  { %1294 = vmatprep.mubr.bf16.mxu1 %v1633_v0  ;;  %v1623_v0 = vcombine.high %v19_v60, %v27_v61 }
  0x28   :  { %1844 = vmatpush3.bf16.msra.mxu0 %v2047_v46  ;;  %v2099_v46 = vld [vmem:[%s2638_s1 + $0x218] sm:$0xff]  }
  0x29   :  { %1872 = vmatpush3.bf16.msra.mxu1 %v2048_v47  ;;  %1845 = vmatprep.subr.bf16.mxu0 %v2049_v48  ;;  %v2100_v47 = vld [vmem:[%s2638_s1 + $0x298] sm:$0xff]   ;;  %v2101_v48 = vld [vmem:[%s2638_s1 + $0x250] sm:$0xff]  }
  0x2a   :  { %1873 = vmatprep.subr.bf16.mxu1 %v2050_v49  ;;  %v2102_v49 = vld [vmem:[%s2638_s1 + $0x2d0] sm:$0xff]  }
  0x2b   :  { %1247 = vmatmul.mubr.bf16.gmra.mxu0 %v1630_v63  ;;  %v1622_v63 = vcombine.low %v19_v60, %v27_v61 }
  0x2c   :  { %1846 = vmatpush3.bf16.msra.mxu0 %v2051_v50  ;;  %1295 = vmatmul.mubr.bf16.gmra.mxu1 %v1632_v2  ;;  %v2103_v50 = vld [vmem:[%s2638_s1 + $0x210] sm:$0xff]  }
  0x2d   :  { %1874 = vmatpush3.bf16.msra.mxu1 %v2052_v51  ;;  %1847 = vmatprep.subr.bf16.mxu0 %v2053_v52  ;;  %v2104_v51 = vld [vmem:[%s2638_s1 + $0x290] sm:$0xff]   ;;  %v2105_v52 = vld [vmem:[%s2638_s1 + $0x248] sm:$0xff]  }
  0x2e   :  { %1875 = vmatprep.subr.bf16.mxu1 %v2054_v53  ;;  %1334 = vmatprep.mubr.bf16.mxu0 %v1619_v18  ;;  %v2106_v53 = vld [vmem:[%s2638_s1 + $0x2c8] sm:$0xff]  }
  0x2f   :  { %1382 = vmatprep.mubr.bf16.mxu1 %v1621_v21  ;;  %v2127_v21 = vld [vmem:[%s2638_s1 + $0x3a8] sm:$0xff]  }
  0x30   :  { %1848 = vmatpush3.bf16.msra.mxu0 %v2055_v54  ;;  %v2107_v54 = vld [vmem:[%s2638_s1 + $0x208] sm:$0xff]  }
  0x31   :  { %1876 = vmatpush3.bf16.msra.mxu1 %v2056_v55  ;;  %1849 = vmatprep.subr.bf16.mxu0 %v2057_v56  ;;  %v2108_v55 = vld [vmem:[%s2638_s1 + $0x288] sm:$0xff]   ;;  %v2109_v56 = vld [vmem:[%s2638_s1 + $0x240] sm:$0xff]  }
  0x32   :  { %1877 = vmatprep.subr.bf16.mxu1 %v2058_v57  ;;  %v2110_v57 = vld [vmem:[%s2638_s1 + $0x2c0] sm:$0xff]  }
  0x34   :  { %1850 = vmatpush3.bf16.msra.mxu0 %v2059_v58  ;;  %v2111_v58 = vld [vmem:[%s2638_s1 + $0x200] sm:$0xff]  }
  0x35   :  { %1878 = vmatpush3.bf16.msra.mxu1 %v2060_v59  ;;  %1851 = vmatprep.subr.bf16.mxu0 %v2064_v1  ;;  %v2112_v59 = vld [vmem:[%s2638_s1 + $0x280] sm:$0xff]   ;;  %v28_v1 = vld [vmem:[%s2639_s0 + $0x68] sm:$0xff] }
  0x36   :  { %1879 = vmatprep.subr.bf16.mxu1 %v2065_v3  ;;  %v1624_v2 = vcombine.low %v20_v62, %v28_v1  ;;  %v1625_v3 = vcombine.high %v20_v62, %v28_v1 }
  0x38   :  { %1852 = vmatpush3.bf16.msra.mxu0 %v2067_v4  ;;  %v2113_v4 = vld [vmem:[%s2638_s1 + $0x378] sm:$0xff]  }
  0x39   :  { %1880 = vmatpush3.bf16.msra.mxu1 %v2068_v5  ;;  %1853 = vmatprep.subr.bf16.mxu0 %v2069_v6  ;;  %v2114_v5 = vld [vmem:[%s2638_s1 + $0x3f8] sm:$0xff]  }
  0x3a   :  { %1881 = vmatprep.subr.bf16.mxu1 %v2070_v7  ;;  %v2115_v6 = vld [vmem:[%s2638_s1 + $0x338] sm:$0xff]  }
  0x3b   :  { %v2116_v7 = vld [vmem:[%s2638_s1 + $0x3b8] sm:$0xff]  }
  0x3c   :  { %1854 = vmatpush3.bf16.msra.mxu0 %v2071_v8  ;;  %v2117_v8 = vld [vmem:[%s2638_s1 + $0x370] sm:$0xff]  }
  0x3d   :  { %1882 = vmatpush3.bf16.msra.mxu1 %v2072_v9  ;;  %1855 = vmatprep.subr.bf16.mxu0 %v2073_v10  ;;  %v2118_v9 = vld [vmem:[%s2638_s1 + $0x3f0] sm:$0xff]  }
  0x3e   :  { %1883 = vmatprep.subr.bf16.mxu1 %v2074_v11  ;;  %v2119_v10 = vld [vmem:[%s2638_s1 + $0x330] sm:$0xff]  }
  0x3f   :  { %v2120_v11 = vld [vmem:[%s2638_s1 + $0x3b0] sm:$0xff]  }
  0x40   :  { %1856 = vmatpush3.bf16.msra.mxu0 %v2075_v12  ;;  %v35_v12 = vld [vmem:[%s2639_s0 + $0xa0] sm:$0x11] }
  0x41   :  { %1884 = vmatpush3.bf16.msra.mxu1 %v2076_v13  ;;  %1897 = vmatprep.subr.bf16.mxu0 %v2077_v22  ;;  %v1639_v13 = vcombine.high %v35_v12, %v35_v12  ;;  %v1638_v14 = vcombine.low %v35_v12, %v35_v12  ;;  %v2129_v22 = vld [vmem:[%s2638_s1 + $0x360] sm:$0xff]  }
  0x42   :  { %1925 = vmatprep.subr.bf16.mxu1 %v2078_v23  ;;  %v2130_v23 = vld [vmem:[%s2638_s1 + $0x3e0] sm:$0xff]  }
  0x43   :  { %1335 = vmatmul.mubr.bf16.vlgmr.msra.gmra.mxu0 %v1618_v17  ;;  %v36_v17 = vld [vmem:[%s2639_s0 + $0xa8] sm:$0x11] }
  0x44   :  { %1383 = vmatmul.mubr.bf16.vlgmr.msra.gmra.mxu1 %v1620_v20  ;;  %1898 = vmatpush3.bf16.msra.mxu0 %v2079_v24  ;;  %v1641_v18 = vcombine.high %v36_v17, %v36_v17  ;;  %v1640_v20 = vcombine.low %v36_v17, %v36_v17  ;;  %v2131_v24 = vld [vmem:[%s2638_s1 + $0x320] sm:$0xff]  }
  0x45   :  { %1926 = vmatpush3.bf16.msra.mxu1 %v2080_v25  ;;  %1899 = vmatprep.subr.bf16.mxu0 %v2081_v26  ;;  %v2132_v25 = vld [vmem:[%s2638_s1 + $0x3a0] sm:$0xff]   ;;  %v2133_v26 = vld [vmem:[%s2638_s1 + $0x358] sm:$0xff]  }
  0x46   :  { %1927 = vmatprep.subr.bf16.mxu1 %v2082_v27  ;;  %1342 = vmatprep.mubr.bf16.mxu0 %v1635_v31  ;;  %v2134_v27 = vld [vmem:[%s2638_s1 + $0x3d8] sm:$0xff]   ;;  %v2138_v31 = vld [vmem:[%s2638_s1 + $0x3d0] sm:$0xff]  }
  0x47   :  { %1390 = vmatprep.mubr.bf16.mxu1 %v1637_v36  ;;  %v2143_v36 = vld [vmem:[%s2638_s1 + $0x308] sm:$0xff]  }
  0x48   :  { %1900 = vmatpush3.bf16.msra.mxu0 %v2083_v28  ;;  %v2135_v28 = vld [vmem:[%s2638_s1 + $0x318] sm:$0xff]  }
  0x49   :  { %1928 = vmatpush3.bf16.msra.mxu1 %v2084_v29  ;;  %1901 = vmatprep.subr.bf16.mxu0 %v2087_v33  ;;  %v2136_v29 = vld [vmem:[%s2638_s1 + $0x398] sm:$0xff]   ;;  %v2140_v33 = vld [vmem:[%s2638_s1 + $0x390] sm:$0xff]  }
  0x4a   :  { %1929 = vmatprep.subr.bf16.mxu1 %v2088_v34  ;;  %v2141_v34 = vld [vmem:[%s2638_s1 + $0x348] sm:$0xff]  }
  0x4b   :  { %1343 = vmatmul.mubr.bf16.gmra.mxu0 %v1634_v32  ;;  %v2139_v32 = vld [vmem:[%s2638_s1 + $0x310] sm:$0xff]  }
  0x4c   :  { %1902 = vmatpush3.bf16.msra.mxu0 %v2090_v37  ;;  %1391 = vmatmul.mubr.bf16.gmra.mxu1 %v1636_v38  ;;  %v2144_v37 = vld [vmem:[%s2638_s1 + $0x388] sm:$0xff]   ;;  %v2145_v38 = vld [vmem:[%s2638_s1 + $0x340] sm:$0xff]  }
  0x4d   :  { %1930 = vmatpush3.bf16.msra.mxu1 %v2091_v39  ;;  %1903 = vmatprep.subr.bf16.mxu0 %v2093_v40  ;;  %v2146_v39 = vld [vmem:[%s2638_s1 + $0x3c0] sm:$0xff]  }
  0x4e   :  { %1931 = vmatprep.subr.bf16.mxu1 %v2094_v41  ;;  %1430 = vmatprep.mubr.bf16.mxu0 %v1623_v0  ;;  %v2147_v40 = vld [vmem:[%s2638_s1 + $0x300] sm:$0xff]  }
  0x4f   :  { %1478 = vmatprep.mubr.bf16.mxu1 %v1625_v3  ;;  %v2148_v41 = vld [vmem:[%s2638_s1 + $0x380] sm:$0xff]  }
  0x50   :  { %1904 = vmatpush3.bf16.msra.mxu0 %v2095_v42  ;;  %v21_v42 = vld [vmem:[%s2639_s0 + $0x30] sm:$0xff] }
  0x51   :  { %1932 = vmatpush3.bf16.msra.mxu1 %v2096_v43  ;;  %1905 = vmatprep.subr.bf16.mxu0 %v2097_v44  ;;  %v29_v43 = vld [vmem:[%s2639_s0 + $0x70] sm:$0xff]  ;;  %v22_v44 = vld [vmem:[%s2639_s0 + $0x38] sm:$0xff] }
  0x52   :  { %1933 = vmatprep.subr.bf16.mxu1 %v2098_v45  ;;  %v1626_v45 = vcombine.low %v21_v42, %v29_v43 }
  0x54   :  { %1906 = vmatpush3.bf16.msra.mxu0 %v2099_v46  ;;  %v1627_v46 = vcombine.high %v21_v42, %v29_v43 }
  0x55   :  { %1934 = vmatpush3.bf16.msra.mxu1 %v2100_v47  ;;  %1907 = vmatprep.subr.bf16.mxu0 %v2101_v48  ;;  %v30_v47 = vld [vmem:[%s2639_s0 + $0x78] sm:$0xff]  ;;  %v37_v48 = vld [vmem:[%s2639_s0 + $0xb0] sm:$0x11] }
  0x56   :  { %1935 = vmatprep.subr.bf16.mxu1 %v2102_v49  ;;  %v38_v49 = vld [vmem:[%s2639_s0 + $0xb8] sm:$0x11] }
  0x58   :  { %1908 = vmatpush3.bf16.msra.mxu0 %v2103_v50  ;;  %v1628_v50 = vcombine.low %v22_v44, %v30_v47 }
  0x59   :  { %1936 = vmatpush3.bf16.msra.mxu1 %v2104_v51  ;;  %1909 = vmatprep.subr.bf16.mxu0 %v2105_v52  ;;  %v1629_v51 = vcombine.high %v22_v44, %v30_v47  ;;  %v1643_v52 = vcombine.high %v37_v48, %v37_v48 }
  0x5a   :  { %1937 = vmatprep.subr.bf16.mxu1 %v2106_v53  ;;  %v1645_v53 = vcombine.high %v38_v49, %v38_v49 }
  0x5c   :  { %1910 = vmatpush3.bf16.msra.mxu0 %v2107_v54  ;;  %v1642_v54 = vcombine.low %v37_v48, %v37_v48 }
  0x5d   :  { %1938 = vmatpush3.bf16.msra.mxu1 %v2108_v55  ;;  %1911 = vmatprep.subr.bf16.mxu0 %v2109_v56  ;;  %v1644_v55 = vcombine.low %v38_v49, %v38_v49 }
  0x5e   :  { %1939 = vmatprep.subr.bf16.mxu1 %v2110_v57 }
  0x60   :  { %1912 = vmatpush3.bf16.msra.mxu0 %v2111_v58  ;;  %v1613_v58 = vld [vmem:[%s2640_s2] ss:$0 sm:$0xff] }
  0x61   :  { %1940 = vmatpush3.bf16.msra.mxu1 %v2112_v59  ;;  %1953 = vmatprep.subr.bf16.mxu0 %v2113_v4 }
  0x62   :  { %1981 = vmatprep.subr.bf16.mxu1 %v2114_v5 }
  0x63   :  { %1431 = vmatmul.mubr.bf16.vlgmr.msra.gmra.mxu0 %v1622_v63 }
  0x64   :  { %1479 = vmatmul.mubr.bf16.vlgmr.msra.gmra.mxu1 %v1624_v2  ;;  %1954 = vmatpush3.bf16.msra.mxu0 %v2115_v6 }
  0x65   :  { %1982 = vmatpush3.bf16.msra.mxu1 %v2116_v7  ;;  %1955 = vmatprep.subr.bf16.mxu0 %v2117_v8 }
  0x66   :  { %1983 = vmatprep.subr.bf16.mxu1 %v2118_v9  ;;  %1438 = vmatprep.mubr.bf16.mxu0 %v1639_v13 }
  0x67   :  { %1486 = vmatprep.mubr.bf16.mxu1 %v1641_v18 }
  0x68   :  { %1956 = vmatpush3.bf16.msra.mxu0 %v2119_v10 }
  0x69   :  { %1984 = vmatpush3.bf16.msra.mxu1 %v2120_v11  ;;  %1957 = vmatprep.subr.bf16.mxu0 %v2123_v15 }
  0x6a   :  { %1985 = vmatprep.subr.bf16.mxu1 %v2124_v16 }
  0x6b   :  { %1439 = vmatmul.mubr.bf16.gmra.mxu0 %v1638_v14 }
  0x6c   :  { %1958 = vmatpush3.bf16.msra.mxu0 %v2126_v19  ;;  %1487 = vmatmul.mubr.bf16.gmra.mxu1 %v1640_v20 }
  0x6d   :  { %1986 = vmatpush3.bf16.msra.mxu1 %v2127_v21  ;;  %1959 = vmatprep.subr.bf16.mxu0 %v2129_v22 }
  0x6e   :  { %1987 = vmatprep.subr.bf16.mxu1 %v2130_v23  ;;  %1526 = vmatprep.mubr.bf16.mxu0 %v1627_v46 }
  0x6f   :  { %1574 = vmatprep.mubr.bf16.mxu1 %v1629_v51 }
  0x70   :  { %1960 = vmatpush3.bf16.msra.mxu0 %v2131_v24 }
  0x71   :  { %1988 = vmatpush3.bf16.msra.mxu1 %v2132_v25  ;;  %1961 = vmatprep.subr.bf16.mxu0 %v2133_v26 }
  0x72   :  { %1989 = vmatprep.subr.bf16.mxu1 %v2134_v27 }
  0x74   :  { %1962 = vmatpush3.bf16.msra.mxu0 %v2135_v28 }
  0x75   :  { %1990 = vmatpush3.bf16.msra.mxu1 %v2136_v29  ;;  %1963 = vmatprep.subr.bf16.mxu0 %v2137_v30 }
  0x76   :  { %1991 = vmatprep.subr.bf16.mxu1 %v2138_v31 }
  0x78   :  { %1964 = vmatpush3.bf16.msra.mxu0 %v2139_v32 }
  0x79   :  { %1992 = vmatpush3.bf16.msra.mxu1 %v2140_v33  ;;  %1965 = vmatprep.subr.bf16.mxu0 %v2141_v34 }
  0x7a   :  { %1993 = vmatprep.subr.bf16.mxu1 %v2142_v35 }
  0x7c   :  { %1966 = vmatpush3.bf16.msra.mxu0 %v2143_v36 }
  0x7d   :  { %1994 = vmatpush3.bf16.msra.mxu1 %v2144_v37  ;;  %1967 = vmatprep.subr.bf16.mxu0 %v2145_v38 }
  0x7e   :  { %1995 = vmatprep.subr.bf16.mxu1 %v2146_v39 }
  0x80   :  { %1968 = vmatpush3.bf16.msra.mxu0 %v2147_v40 }
  0x81   :  { %1996 = vmatpush3.bf16.msra.mxu1 %v2148_v41 }
  0x83   :  { %1527 = vmatmul.mubr.bf16.vlgmr.msra.gmra.mxu0 %v1626_v45 }
  0x84   :  { %1575 = vmatmul.mubr.bf16.vlgmr.msra.gmra.mxu1 %v1628_v50  ;;  %1534 = vmatprep.mubr.bf16.mxu0 %v1643_v52 }
  0x85   :  { %1582 = vmatprep.mubr.bf16.mxu1 %v1645_v53 }
  0x8b   :  { %1535 = vmatmul.mubr.bf16.gmra.mxu0 %v1642_v54 }
  0x8c   :  { %1583 = vmatmul.mubr.bf16.gmra.mxu1 %v1644_v55 }
  0xe3   :  { %v1801_v56 = vpop.f32.mrf.mxu0 }
  0xe4   :  { %v1829_v57 = vpop.f32.mrf.mxu1 }
  0xe5   :  { %v1802_v59 = vpop.f32.mrf.mxu0 }
  0xe6   :  { %v1803_v60 = vadd.f32 %v1802_v59, %v1801_v56  ;;  %v1830_v61 = vpop.f32.mrf.mxu1 }
  0xe7   :  { %v1831_v62 = vadd.f32 %v1830_v61, %v1829_v57  ;;  %v1804_v63 = vpop.f32.mrf.mxu0 }
  0xe8   :  { %v1241_v0 = vadd.f32 %v1803_v60, %v1613_v58  ;;  %v1832_v1 = vpop.f32.mrf.mxu1 }
  0xe9   :  { %v1805_v2 = vpop.f32.mrf.mxu0 }
  0xea   :  { %v1289_v3 = vadd.f32 %v1831_v62, %v1241_v0  ;;  %v1806_v4 = vadd.f32 %v1805_v2, %v1804_v63  ;;  %v1833_v5 = vpop.f32.mrf.mxu1 }
  0xeb   :  { %v1834_v6 = vadd.f32 %v1833_v5, %v1832_v1  ;;  %v1807_v9 = vpop.f32.mrf.mxu0 }
  0xec   :  { %v1244_v7 = vadd.f32 %v1806_v4, %v1613_v58  ;;  %v1835_v10 = vpop.f32.mrf.mxu1 }
  0xed   :  { %v1808_v11 = vpop.f32.mrf.mxu0 }
  0xee   :  { %v1292_v8 = vadd.f32 %v1834_v6, %v1244_v7  ;;  %v1809_v12 = vadd.f32 %v1808_v11, %v1807_v9  ;;  %v1836_v13 = vpop.f32.mrf.mxu1 }
  0xef   :  { %v1810_v14 = vpop.f32.mrf.mxu0  ;;  %v1837_v15 = vadd.f32 %v1836_v13, %v1835_v10 }
  0xf0   :  { %v1249_v16 = vadd.f32 %v1809_v12, %v1613_v58  ;;  %v1838_v17 = vpop.f32.mrf.mxu1 }
  0xf1   :  { %v1811_v18 = vpop.f32.mrf.mxu0 }
  0xf2   :  { %v1297_v19 = vadd.f32 %v1837_v15, %v1249_v16  ;;  %v1839_v20 = vpop.f32.mrf.mxu1 }
 0x103   :  { %v1857_v21 = vpop.f32.mrf.mxu0 }
 0x104   :  { %v1885_v22 = vpop.f32.mrf.mxu1 }
 0x105   :  { %v1858_v23 = vpop.f32.mrf.mxu0 }
 0x106   :  { %v1859_v24 = vadd.f32 %v1858_v23, %v1857_v21  ;;  %v1886_v25 = vpop.f32.mrf.mxu1 }
 0x107   :  { %v1887_v26 = vadd.f32 %v1886_v25, %v1885_v22  ;;  %v1860_v27 = vpop.f32.mrf.mxu0 }
 0x108   :  { %v1337_v28 = vadd.f32 %v1859_v24, %v1289_v3  ;;  %v1888_v29 = vpop.f32.mrf.mxu1 }
 0x109   :  { %v1861_v30 = vpop.f32.mrf.mxu0 }
 0x10a   :  { %v1385_v31 = vadd.f32 %v1887_v26, %v1337_v28  ;;  %v1889_v33 = vpop.f32.mrf.mxu1  ;;  %v1862_v57 = vadd.f32 %v1861_v30, %v1860_v27 }
 0x10b   :  { %v1863_v32 = vpop.f32.mrf.mxu0  ;;  %v1890_v61 = vadd.f32 %v1889_v33, %v1888_v29 }
 0x10c   :  { %v1891_v35 = vpop.f32.mrf.mxu1  ;;  %v1340_v59 = vadd.f32 %v1862_v57, %v1292_v8 }
 0x10d   :  { %v1864_v34 = vpop.f32.mrf.mxu0 }
 0x10e   :  { %v1892_v37 = vpop.f32.mrf.mxu1  ;;  %v1865_v60 = vadd.f32 %v1864_v34, %v1863_v32  ;;  %v1388_v1 = vadd.f32 %v1890_v61, %v1340_v59 }
 0x10f   :  { %v1866_v36 = vpop.f32.mrf.mxu0  ;;  %v1893_v4 = vadd.f32 %v1892_v37, %v1891_v35 }
 0x110   :  { %v1894_v39 = vpop.f32.mrf.mxu1  ;;  %v1345_v3 = vadd.f32 %v1865_v60, %v1297_v19 }
 0x111   :  { %v1867_v38 = vpop.f32.mrf.mxu0 }
 0x112   :  { %v1895_v40 = vpop.f32.mrf.mxu1  ;;  %v1393_v15 = vadd.f32 %v1893_v4, %v1345_v3 }
 0x123   :  { %v1913_v41 = vpop.f32.mrf.mxu0 }
 0x124   :  { %v1941_v42 = vpop.f32.mrf.mxu1 }
 0x125   :  { %v1914_v43 = vpop.f32.mrf.mxu0 }
 0x126   :  { %v1942_v44 = vpop.f32.mrf.mxu1  ;;  %v1915_v58 = vadd.f32 %v1914_v43, %v1913_v41 }
 0x127   :  { %v1916_v45 = vpop.f32.mrf.mxu0  ;;  %v1943_v0 = vadd.f32 %v1942_v44, %v1941_v42 }
 0x128   :  { %v1944_v46 = vpop.f32.mrf.mxu1  ;;  %v1433_v63 = vadd.f32 %v1915_v58, %v1385_v31 }
 0x129   :  { %v1917_v47 = vpop.f32.mrf.mxu0 }
 0x12a   :  { %v1945_v49 = vpop.f32.mrf.mxu1  ;;  %v1918_v62 = vadd.f32 %v1917_v47, %v1916_v45  ;;  %v1481_v9 = vadd.f32 %v1943_v0, %v1433_v63 }
 0x12b   :  { %v1919_v48 = vpop.f32.mrf.mxu0  ;;  %v1946_v13 = vadd.f32 %v1945_v49, %v1944_v46 }
 0x12c   :  { %v1947_v51 = vpop.f32.mrf.mxu1  ;;  %v1436_v6 = vadd.f32 %v1918_v62, %v1388_v1 }
 0x12d   :  { %v1920_v50 = vpop.f32.mrf.mxu0 }
 0x12e   :  { %v1948_v53 = vpop.f32.mrf.mxu1  ;;  %v1921_v10 = vadd.f32 %v1920_v50, %v1919_v48  ;;  %v1484_v17 = vadd.f32 %v1946_v13, %v1436_v6 }
 0x12f   :  { %v1922_v52 = vpop.f32.mrf.mxu0  ;;  %v1949_v21 = vadd.f32 %v1948_v53, %v1947_v51 }
 0x130   :  { %v1950_v55 = vpop.f32.mrf.mxu1  ;;  %v1441_v20 = vadd.f32 %v1921_v10, %v1393_v15 }
 0x131   :  { %v1923_v54 = vpop.f32.mrf.mxu0 }
 0x132   :  { %v1951_v56 = vpop.f32.mrf.mxu1  ;;  %v1489_v30 = vadd.f32 %v1949_v21, %v1441_v20 }
 0x143   :  { %v1969_v2 = vpop.f32.mrf.mxu0 }
 0x144   :  { %v1997_v5 = vpop.f32.mrf.mxu1 }
 0x145   :  { %v1970_v7 = vpop.f32.mrf.mxu0 }
 0x146   :  { %v1971_v11 = vadd.f32 %v1970_v7, %v1969_v2  ;;  %v1998_v12 = vpop.f32.mrf.mxu1 }
 0x147   :  { %v1972_v14 = vpop.f32.mrf.mxu0  ;;  %v1999_v22 = vadd.f32 %v1998_v12, %v1997_v5 }
 0x148   :  { %v1529_v8 = vadd.f32 %v1971_v11, %v1481_v9  ;;  %v2000_v16 = vpop.f32.mrf.mxu1 }
 0x149   :  { %v1973_v18 = vpop.f32.mrf.mxu0 }
 0x14a   :  { %v1974_v23 = vadd.f32 %v1973_v18, %v1972_v14  ;;  %v2001_v19 = vpop.f32.mrf.mxu1  ;;  %v1577_v25 = vadd.f32 %v1999_v22, %v1529_v8 }
 0x14b   :  { %v1975_v24 = vpop.f32.mrf.mxu0  ;;  %v2002_v27 = vadd.f32 %v2001_v19, %v2000_v16 }
 0x14c   :  { %v1532_v26 = vadd.f32 %v1974_v23, %v1484_v17  ;;  %v2003_v28 = vpop.f32.mrf.mxu1  ;;  %v1590_v35 = vmax.f32 %v1577_v25, 0.0 }
 0x14d   :  { %v1976_v29 = vpop.f32.mrf.mxu0 }
 0x14e   :  { %v1580_v31 = vadd.f32 %v2002_v27, %v1532_v26  ;;  %v1977_v32 = vadd.f32 %v1976_v29, %v1975_v24  ;;  %v2004_v33 = vpop.f32.mrf.mxu1 }
 0x14f   :  { %v1978_v34 = vpop.f32.mrf.mxu0  ;;  %v2005_v38 = vadd.f32 %v2004_v33, %v2003_v28 }
 0x150   :  { %v1591_v36 = vmax.f32 %v1580_v31, 0.0  ;;  %v1537_v37 = vadd.f32 %v1977_v32, %v1489_v30  ;;  %v2006_v39 = vpop.f32.mrf.mxu1 }
 0x151   :  { %v1979_v40 = vpop.f32.mrf.mxu0 }
 0x152   :  { %v1783_v41 = vpack.c.bf16 %v1591_v36, %v1590_v35  ;;  %v1585_v42 = vadd.f32 %v2005_v38, %v1537_v37  ;;  %v2007_v43 = vpop.f32.mrf.mxu1 }
 0x154   :  { %v1592_v44 = vmax.f32 %v1585_v42, 0.0  ;;  %1784 = vst [vmem:[%s2641_s3] sm:$0xff] %v1783_v41  }
 0x156   :  { %v1779_v45 = vpack.c.bf16 %v1592_v44, %v1592_v44 }
 0x158   :  { %1608 = vst [vmem:[%s2641_s3 + $0x8] sm:$0x1] %v1779_v45 }

</bundles_post_ra>
